<compile_context>
chip_gen: v7x
topology: tpu7x:2x2x1
jax: 0.10.0
libtpu: 0.0.40
codegen_flags: <defaults>
</compile_context>

<pallas_src>
import math
import functools

import jax
import jax.numpy as jnp
from jax import lax
from jax.experimental import pallas as pl
from jax.experimental.pallas import tpu as pltpu

NEG_INF = 1e10          # matches DotProductAttention inf=1e10 (masked logits -> -1e10)
HP = lax.Precision.HIGHEST


# ------------------------------ tiling helpers ------------------------------ #
def _row_tile(rows, cap=512):
    """Largest power-of-two row tile <= cap dividing `rows`, preferring >= 2 grid steps."""
    for prefer_multi in (True, False):
        for t in (512, 256, 128, 64, 32, 16, 8):
            if t <= cap and rows % t == 0 and (not prefer_multi or rows // t >= 2):
                return t
    return rows


def _batch_tile(batch, n, d, itemsize=4, budget_bytes=24 << 20):
    """Batch tile sized from a VMEM budget for double-buffered K1/V/K2 blocks,
    preferring >= 2 grid steps (v7x has 2 TensorCores)."""
    per_b = 2 * 3 * n * d * itemsize
    cap = max(1, min(128, budget_bytes // per_b, batch))
    for prefer_multi in (True, False):
        for t in range(cap, 0, -1):
            if batch % t == 0 and (not prefer_multi or batch // t >= 2):
                return t
    return 1


# ------------------------------ static kernel ------------------------------- #
def _static_kernel(x_ref, w_ref, k1_ref, v_ref, k2_ref):
    D = x_ref.shape[1]
    # One fused (TM, D) @ (D, 3D) matmul; split at 128-lane boundaries.
    kvk = jnp.dot(x_ref[...], w_ref[...],
                  preferred_element_type=jnp.float32, precision=HP)
    k1_ref[...] = kvk[:, :D]
    v_ref[...] = kvk[:, D:2 * D]
    k2_ref[...] = kvk[:, 2 * D:]


def decoder_cell_static(node_emb, graph_emb, Wq_fixed, Wk1, Wv, Wk2, Wout,
                        n_heads=8):
    """Returns (Q_fixed (B,D), K1T (B,D,N), VT (B,D,N), K2f (B,N,D)) with the MHA
    scale folded into K1 and Wout + the SHA scale folded into K2."""
    B, N, D = node_emb.shape
    hd = D // n_heads

    # Q_fixed: single small matmul, hoisted out of the grid.
    Q_fixed = jnp.dot(graph_emb, Wq_fixed, precision=HP)              # (B, D)

    # Static-time weight folds (exact algebraic identities).
    Wk1f = Wk1 / math.sqrt(hd)                                        # MHA scale
    Wk2f = jnp.dot(Wk2, Wout.T, precision=HP) / math.sqrt(D)          # Wout + SHA scale
    w_cat = jnp.concatenate([Wk1f, Wv, Wk2f], axis=1)                 # (D, 3D)

    x2 = node_emb.reshape(B * N, D)
    BN = B * N
    TM = _row_tile(BN)
    out_sd = jax.ShapeDtypeStruct((BN, D), jnp.float32)
    k1, v, k2 = pl.pallas_call(
        _static_kernel,
        out_shape=(out_sd, out_sd, out_sd),
        grid=(BN // TM,),
        in_specs=[
            pl.BlockSpec((TM, D), lambda i: (i, 0)),
            pl.BlockSpec((D, 3 * D), lambda i: (0, 0)),
        ],
        out_specs=(
            pl.BlockSpec((TM, D), lambda i: (i, 0)),
            pl.BlockSpec((TM, D), lambda i: (i, 0)),
            pl.BlockSpec((TM, D), lambda i: (i, 0)),
        ),
        compiler_params=pltpu.CompilerParams(dimension_semantics=("parallel",)),
    )(x2, w_cat)

    # One-time layout change (amortized over ~2N decode steps): K1/V head-major
    # transposed so the per-step kernel keeps N on the lane axis.
    K1T = jnp.swapaxes(k1.reshape(B, N, D), 1, 2)                     # (B, D, N)
    VT = jnp.swapaxes(v.reshape(B, N, D), 1, 2)                       # (B, D, N)
    K2f = k2.reshape(B, N, D)                                         # (B, N, D)
    return Q_fixed, K1T, VT, K2f


# ------------------------------ dynamic kernel ------------------------------ #
def _dynamic_kernel(n_heads, clip,
                    scd_ref, sc1_ref, qf_ref, k1t_ref, vt_ref, k2_ref, mask_ref,
                    wqs_ref, wqs1_ref, out_ref):
    Bt, D, N = k1t_ref.shape
    H = n_heads
    hd = D // H

    scd = scd_ref[...].reshape(Bt, D)
    sc1 = sc1_ref[...].reshape(Bt, 1)
    qf = qf_ref[...].reshape(Bt, D)
    mask = mask_ref[...].reshape(Bt, N)                 # 1.0 == visited / masked

    # Q1 = Q_fixed + step_context @ Wq_step  (clean (D,D) matmul + rank-1 correction)
    q1 = qf + jnp.dot(scd, wqs_ref[...],
                      preferred_element_type=jnp.float32, precision=HP)
    q1 = q1 + sc1 * wqs1_ref[...]                       # (Bt, D)

    # ---- MHA scores: VPU multiply + per-head sublane-segment reduce; N on lanes ----
    prod = q1[:, :, None] * k1t_ref[...]                # (Bt, D, N)
    scores = jnp.sum(prod.reshape(Bt, H, hd, N), axis=2)     # (Bt, H, N)
    scores = jnp.where(mask[:, None, :] > 0.5, -NEG_INF, scores)

    # lane-dense softmax over nodes
    scores = scores - jnp.max(scores, axis=-1, keepdims=True)
    p = jnp.exp(scores)
    p = p / jnp.sum(p, axis=-1, keepdims=True)          # (Bt, H, N)

    # ---- attention context: sublane-broadcast p over head_depth, lane reduce over N ----
    p_full = jnp.broadcast_to(p[:, :, None, :], (Bt, H, hd, N)).reshape(Bt, D, N)
    q2 = jnp.sum(p_full * vt_ref[...], axis=-1)         # (Bt, D)   (Wout folded into K2)

    # ---- single-head logits: VPU multiply + lane reduce (scale folded into K2) ----
    logits = jnp.sum(q2[:, None, :] * k2_ref[...], axis=-1)  # (Bt, N)
    logits = clip * jnp.tanh(logits)
    out_ref[...] = jnp.where(mask > 0.5, -NEG_INF, logits).reshape(Bt, 1, N)


def decoder_cell_dynamic(step_context, Q_fixed, K1T, VT, K2f, mask_f,
                         Wq_step, n_heads=8, clip=10.0):
    """step_context: (B, 1, D+1); Q_fixed: (B, D); K1T/VT: (B, D, N); K2f: (B, N, D);
       mask_f: (B, N) float (1.0 == visited).  Returns logits (B, N)."""
    B, D, N = K1T.shape

    # Split step context / Wq_step so the contraction stays a clean (D, D) matmul.
    sc = step_context.reshape(B, 1, D + 1)
    sc_d, sc_1 = sc[:, :, :D], sc[:, :, D:]             # (B,1,D), (B,1,1)
    Wqs_d, Wqs_1 = Wq_step[:D, :], Wq_step[D:, :]       # (D, D), (1, D)

    Bt = _batch_tile(B, N, D)
    # Explicit VMEM budget: double-buffered K1T/VT/K2f blocks + small operands + weights.
    est = 4 * (2 * (3 * Bt * N * D + 2 * Bt * D + 2 * Bt * N + 2 * Bt) + D * D + 3 * D)
    vmem_limit = int(min(48 << 20, max(16 << 20, 2 * est)))

    kernel = functools.partial(_dynamic_kernel, n_heads, clip)
    logits = pl.pallas_call(
        kernel,
        out_shape=jax.ShapeDtypeStruct((B, 1, N), jnp.float32),
        grid=(B // Bt,),
        in_specs=[
            pl.BlockSpec((Bt, 1, D), lambda b: (b, 0, 0)),    # step ctx (main)
            pl.BlockSpec((Bt, 1, 1), lambda b: (b, 0, 0)),    # step ctx (last col)
            pl.BlockSpec((Bt, 1, D), lambda b: (b, 0, 0)),    # Q_fixed
            pl.BlockSpec((Bt, D, N), lambda b: (b, 0, 0)),    # K1 (head-major, scaled)
            pl.BlockSpec((Bt, D, N), lambda b: (b, 0, 0)),    # V  (head-major)
            pl.BlockSpec((Bt, N, D), lambda b: (b, 0, 0)),    # K2 (Wout + scale folded)
            pl.BlockSpec((Bt, 1, N), lambda b: (b, 0, 0)),    # mask
            pl.BlockSpec((D, D), lambda b: (0, 0)),           # Wq_step[:D]
            pl.BlockSpec((1, D), lambda b: (0, 0)),           # Wq_step[D:]
        ],
        out_specs=pl.BlockSpec((Bt, 1, N), lambda b: (b, 0, 0)),
        compiler_params=pltpu.CompilerParams(
            dimension_semantics=("parallel",), vmem_limit_bytes=vmem_limit),
    )(sc_d, sc_1, Q_fixed.reshape(B, 1, D), K1T, VT, K2f, mask_f.reshape(B, 1, N),
      Wqs_d, Wqs_1)
    return logits.reshape(B, N)


# ---------------------------- pure-JAX reference ----------------------------- #
def reference(node_emb, graph_emb, step_context, mask_f,
              Wq_fixed, Wk1, Wv, Wk2, Wq_step, Wout, n_heads, clip):
    B, N, D = node_emb.shape
    hd = D // n_heads
    Qf = jnp.matmul(graph_emb[:, None, :], Wq_fixed, precision=HP)
    K1 = jnp.matmul(node_emb, Wk1, precision=HP)
    V = jnp.matmul(node_emb, Wv, precision=HP)
    K2 = jnp.matmul(node_emb, Wk2, precision=HP)
    Qs = jnp.matmul(step_context, Wq_step, precision=HP)
    Q1 = Qf + Qs

    def split(T):
        return T.reshape(B, T.shape[1], n_heads, hd).transpose(0, 2, 1, 3)

    Qh, Kh, Vh = split(Q1), split(K1), split(V)
    lg = jnp.einsum('bhqd,bhkd->bhqk', Qh, Kh, precision=HP) / math.sqrt(hd)
    lg = jnp.where(mask_f[:, None, None, :] > 0.5, -NEG_INF, lg)
    p = jax.nn.softmax(lg, axis=-1)
    out = jnp.einsum('bhqk,bhkd->bhqd', p, Vh, precision=HP)
    out = out.transpose(0, 2, 1, 3).reshape(B, 1, D)
    Q2 = jnp.matmul(out, Wout, precision=HP)
    lg2 = jnp.einsum('bqd,bkd->bqk', Q2, K2, precision=HP) / math.sqrt(D)
    lg2 = clip * jnp.tanh(lg2)
    lg2 = jnp.where(mask_f[:, None, :] > 0.5, -NEG_INF, lg2)
    return lg2[:, 0, :]


# ----------------------------------- main ------------------------------------ #
if __name__ == "__main__":
    B, N, D, H = 2, 16, 128, 8            # batch, n_nodes, embed_dim, n_heads
    hd = D // H
    clip = 10.0

    key = jax.random.PRNGKey(0)
    ks = jax.random.split(key, 10)

    def u(k, shape, s):
        return jax.random.uniform(k, shape, jnp.float32, -s, s)

    stdv = 1.0 / math.sqrt(hd)
    Wk1 = u(ks[0], (D, D), stdv)
    Wv = u(ks[1], (D, D), stdv)
    Wk2 = u(ks[2], (D, D), stdv)
    Wq_fixed = u(ks[3], (D, D), stdv)
    Wout = u(ks[4], (D, D), 1.0 / math.sqrt(D))
    Wq_step = u(ks[5], (D + 1, D), stdv)

    node_emb = jax.random.normal(ks[6], (B, N, D), jnp.float32)
    graph_emb = jnp.mean(node_emb, axis=1)                          # (B, D)
    step_context = jax.random.normal(ks[7], (B, 1, D + 1), jnp.float32)

    # mask: (B, N) float; 1.0 == already-visited node (gets -inf logits)
    idx = jnp.arange(N)[None, :]
    mask_f = (idx < jnp.array([3, 5])[:, None]).astype(jnp.float32)

    # compute_static (Pallas): fused K1/V/K2 projection, Wout & scales folded in
    Q_fixed, K1T, VT, K2f = decoder_cell_static(
        node_emb, graph_emb, Wq_fixed, Wk1, Wv, Wk2, Wout, n_heads=H)

    # compute_dynamic (Pallas): masked, clipped logits for this decoding step
    logits = decoder_cell_dynamic(step_context, Q_fixed, K1T, VT, K2f, mask_f,
                                  Wq_step, n_heads=H, clip=clip)
    logits = jax.block_until_ready(logits)

    ref = reference(node_emb, graph_emb, step_context, mask_f,
                    Wq_fixed, Wk1, Wv, Wk2, Wq_step, Wout, H, clip)

    assert logits.shape == (B, N), logits.shape
    assert jnp.allclose(logits, ref, rtol=2e-3, atol=2e-3), (
        float(jnp.max(jnp.abs(logits - ref))))
    print("KERNEL_OK")
</pallas_src>

<mosaic_0001>
module attributes {stable_mosaic.version = 11 : i64} {
  func.func @_static_kernel(%arg0: i32, %arg1: memref<16x128xf32, #tpu.memory_space<vmem>>, %arg2: memref<128x384xf32, #tpu.memory_space<vmem>>, %arg3: memref<16x128xf32, #tpu.memory_space<vmem>>, %arg4: memref<16x128xf32, #tpu.memory_space<vmem>>, %arg5: memref<16x128xf32, #tpu.memory_space<vmem>>) attributes {dimension_semantics = [#tpu.dimension_semantics<parallel>], iteration_bounds = array<i64: 2>, scalar_prefetch = 0 : i64, scratch_operands = 0 : i64, tpu.core_type = #tpu.core_type<tc>, window_params = [{transform_indices = @transform_0, window_bounds = array<i64: 16, 128>}, {pipeline_mode = #tpu.pipeline_mode<synchronous>, transform_indices = @transform_1, window_bounds = array<i64: 128, 384>}, {transform_indices = @transform_2, window_bounds = array<i64: 16, 128>}, {transform_indices = @transform_3, window_bounds = array<i64: 16, 128>}, {transform_indices = @transform_4, window_bounds = array<i64: 16, 128>}]} {
    %c0 = arith.constant 0 : index
    %c0_0 = arith.constant 0 : index
    %0 = vector.load %arg1[%c0, %c0_0] : memref<16x128xf32, #tpu.memory_space<vmem>>, vector<16x128xf32>
    %c0_1 = arith.constant 0 : index
    %c0_2 = arith.constant 0 : index
    %1 = vector.load %arg2[%c0_1, %c0_2] : memref<128x384xf32, #tpu.memory_space<vmem>>, vector<128x384xf32>
    %cst = arith.constant dense<0.000000e+00> : vector<16x384xf32>
    %2 = tpu.matmul %0, %1, %cst {dimension_numbers = #tpu.dot_dimension_numbers<[1], [0], [0], [1], [0, 0, 1, 1], [], []>, precision = #tpu.contract_precision<fp32>} : vector<16x128xf32>, vector<128x384xf32>, vector<16x384xf32> -> vector<16x384xf32>
    %3 = vector.extract_strided_slice %2 {offsets = [0, 0], sizes = [16, 128], strides = [1, 1]} : vector<16x384xf32> to vector<16x128xf32>
    %c0_3 = arith.constant 0 : index
    %c0_4 = arith.constant 0 : index
    %4 = vector.load %arg3[%c0_3, %c0_4] : memref<16x128xf32, #tpu.memory_space<vmem>>, vector<16x128xf32>
    tpu.vector_store %arg3[%c0_3, %c0_4], %3 {strides = array<i32>} : memref<16x128xf32, #tpu.memory_space<vmem>>, vector<16x128xf32>,
    %5 = vector.extract_strided_slice %2 {offsets = [0, 128], sizes = [16, 128], strides = [1, 1]} : vector<16x384xf32> to vector<16x128xf32>
    %c0_5 = arith.constant 0 : index
    %c0_6 = arith.constant 0 : index
    %6 = vector.load %arg4[%c0_5, %c0_6] : memref<16x128xf32, #tpu.memory_space<vmem>>, vector<16x128xf32>
    tpu.vector_store %arg4[%c0_5, %c0_6], %5 {strides = array<i32>} : memref<16x128xf32, #tpu.memory_space<vmem>>, vector<16x128xf32>,
    %7 = vector.extract_strided_slice %2 {offsets = [0, 256], sizes = [16, 128], strides = [1, 1]} : vector<16x384xf32> to vector<16x128xf32>
    %c0_7 = arith.constant 0 : index
    %c0_8 = arith.constant 0 : index
    %8 = vector.load %arg5[%c0_7, %c0_8] : memref<16x128xf32, #tpu.memory_space<vmem>>, vector<16x128xf32>
    tpu.vector_store %arg5[%c0_7, %c0_8], %7 {strides = array<i32>} : memref<16x128xf32, #tpu.memory_space<vmem>>, vector<16x128xf32>,
    return
  }
  func.func @transform_0(%arg0: i32) -> (i32, i32) {
    %c0_i32 = arith.constant 0 : i32
    %c0_i32_0 = arith.constant 0 : i32
    return %arg0, %c0_i32 : i32, i32
  }
  func.func @transform_1(%arg0: i32) -> (i32, i32) {
    %c0_i32 = arith.constant 0 : i32
    %c0_i32_0 = arith.constant 0 : i32
    %c0_i32_1 = arith.constant 0 : i32
    return %c0_i32, %c0_i32_0 : i32, i32
  }
  func.func @transform_2(%arg0: i32) -> (i32, i32) {
    %c0_i32 = arith.constant 0 : i32
    %c0_i32_0 = arith.constant 0 : i32
    return %arg0, %c0_i32 : i32, i32
  }
  func.func @transform_3(%arg0: i32) -> (i32, i32) {
    %c0_i32 = arith.constant 0 : i32
    %c0_i32_0 = arith.constant 0 : i32
    return %arg0, %c0_i32 : i32, i32
  }
  func.func @transform_4(%arg0: i32) -> (i32, i32) {
    %c0_i32 = arith.constant 0 : i32
    %c0_i32_0 = arith.constant 0 : i32
    return %arg0, %c0_i32 : i32, i32
  }
}

</mosaic_0001>

<bundles_post_ra>
// kernel: tpu_custom_call.1
= control target key start
LH: loop header
LB: loop body
LE: loop exit
PB: predicated region body
PF: predicated region fallthrough
CT: control target
= control target key end

     0   :  { %10 = vsyncpa [#allocation3], 0  ;;  %s4281_s0 = inlined_call_operand.hbm [shape: f32[32,128], index: 0, kind: input, shape index: {}]   ;;  %s4282_s1 = inlined_call_operand.hbm [shape: f32[128,384], index: 1, kind: input, shape index: {}]   ;;  %s4283_s2 = inlined_call_operand.hbm [shape: f32[32,128], index: 2, kind: output, shape index: {0}]   ;;  %s4284_s3 = inlined_call_operand.hbm [shape: f32[32,128], index: 3, kind: output, shape index: {1}]   ;;  %s4285_s4 = inlined_call_operand.hbm [shape: f32[32,128], index: 4, kind: output, shape index: {2}]  }
   0x1   :  { %12 = vsyncpa [#allocation3 + $0x1], 0 }
   0x2   :  { %13 = vsyncpa [#allocation6], 0 }
   0x3   :  { %14 = vsyncpa [#allocation4], 0 }
   0x4   :  { %16 = vsyncpa [#allocation4 + $0x1], 0 }
   0x5   :  { %17 = vsyncpa [#allocation9], 0 }
   0x6   :  { %19 = vsyncpa [#allocation9 + $0x1], 0  ;;  %s3158_s15 = smov 0   ;;  %s3160_s16 = smov 0  }
   0x7   :  { %s3162_s17 = smov 0   ;;  %s3164_s18 = smov 0  }
   0x8 LB: > { %s3179_s19 = sadd.s32 4294967295, %s3119_s18   ;;  %s4425_s20 = sadd.s32 4294967294, %s3119_s18   ;;  %s3119_s18 = sphi %s3164_s18, %s4603_s18   ;;  %s3115_s17 = sphi %s3162_s17, %s4602_s17   ;;  %s3111_s16 = sphi %s3160_s16, %s4601_s16   ;;  %s3107_s15 = sphi %s3158_s15, %s4600_s15  }
   0x9   : > { %p45_p0 = scmp.ne.s32.totalorder %s3111_s16, %s3107_s15  ;;  %p4286_p1 = scmp.eq.s32.totalorder %s3179_s19, 0 }
   0xa   : > { %p96_p3 = scmp.eq.s32.totalorder %s4425_s20, 1  ;;  %p2098_p5 = scmp.ge.s32.totalorder %s3119_s18, 1 }
   0xb   : > { %p3190_p4 = por %p4286_p1, %p45_p0  ;;  %p155_p7 = scmp.lt.s32.totalorder %s3119_s18, 3 }
   0xc   : > { %p3195_p6 = por %p96_p3, %p45_p0  ;;  %s3121_s24 = smov [#allocation5]  }
   0xd   : > { %s4426_s21 = scalar_select %p3190_p4, 1, 0 }
   0xe   : > { %s4427_s22 = scalar_select %p3195_p6, 1, 0 }
   0xf   : > { %p3200_p8 = pnand %p2098_p5, %p155_p7  ;;  %s167_s25 = sshll.u32 %s3121_s24, 4  ;;  %s3204_s25 = int_to_ptr.vmem [resolvable:$true] %s167_s25 }
  0x10   : > { %s3216_s27 = sadd.s32 1, %s3119_s18   ;;  %s32_s28 = sadd.s32 1, %s3115_s17 }
  0x11   : > { %s4428_s23 = scalar_select %p3200_p8, 1, 0 }
  0x12   : > { %p2869_p9 = pneg %p3200_p8  ;;  %s29_s29 = ssub.s32 %s3119_s18, %s3216_s27 }
  0x13   : > { %s2931_s6 = scalar_lea.hbm %s4282_s1, 6144 }
  0x14   : > { %p3211_p11 = pnand %p2869_p9, %p4286_p1  ;;  %p2932_p12 = scmp.ne.s32.totalorder %s4282_s1, %s2931_s6 }
  0x15   : > { %p2938_p5 = scmp.lt.u32.totalorder %s2931_s6, %s4282_s1 }
  0x16   : > { %p2933_p13 = pneg %p3211_p11 }
  0x18   : > { %p2934_p0 = pnand %p2933_p13, %p2932_p12 }
  0x1a   : > { %p2935_p3 = pneg %p2934_p0 }
  0x1c   : > { %p2940_p7 = pnand %p2938_p5, %p2935_p3 }
  0x1e   : > { %2943 = shalt.err (!%p2940_p7)
}
  0x1f   : > { %s2944_s11 = scalar_lea.vmem %s3204_s25, 6144  ;;  %p2952_p2 = scmp.lt.s32.totalorder %s3204_s25, %s3204_s25 }
  0x20   : > { %p2945_p9 = scmp.ne.s32.totalorder %s3204_s25, %s2944_s11  ;;  %p2953_p6 = scmp.lt.s32.totalorder %s2944_s11, %s2944_s11 }
  0x22   : > { %p2947_p10 = pnand %p2945_p9, %p2933_p13  ;;  %p2954_p4 = por %p2953_p6, %p2952_p2 }
  0x24   : > { %p2948_p1 = pneg %p2947_p10 }
  0x26   : > { %p2955_p8 = pnand %p2954_p4, %p2948_p1 }
  0x28   : > { %2958 = shalt.err (!%p2955_p8)
}
  0x29   : > { %s3122_s12 = smov 384   ;;  %s3123_s13 = smov 24  }
  0x2a   : > { %2872 = dma.hbm_to_vmem [thread:$0]  (!%p3211_p11), %s4282_s1, 6144, %s3204_s25, [#allocation6], %s3122_s12, %s3122_s12, %s3123_s13  }
  0x2b   : > { %p30_p2 = scmp.eq.s32.totalorder %s29_s29, 0  ;;  %p39_p1 = scmp.ne.s32.totalorder %s3115_s17, %s3111_s16 }
  0x2c   : > { %p40_p4 = scmp.eq.s32.totalorder %s3119_s18, 0  ;;  %p2888_p6 = scmp.lt.s32.totalorder %s3119_s18, 2 }
  0x2d   : > { %s3247_s30 = scalar_select %p30_p2, %s3115_s17, %s32_s28  }
  0x2e   : > { %p41_p8 = por %p40_p4, %p39_p1  ;;  %p4430_p10 = scmp.eq.s32.totalorder %s3179_s19, 1 }
  0x2f   : > { %s181_s6 = sand.u32 1, %s3115_s17   ;;  %s2121_s7 = sshll.u32 %s3119_s18, 8 }
  0x30   : > { %p3251_p12 = por %p4430_p10, %p39_p1  ;;  %s2101_s8 = sshll.u32 %s181_s6, 4 }
  0x31   : > { %s3260_s10 = scalar_lea.hbm %s4281_s0, %s2121_s7  ;;  %s185_s25 = scalar_lea.vmem [#allocation2], %s2101_s8 }
  0x32   : > { %s192_s28 = sshll.u32 %s185_s25, 4  ;;  %p3262_p11 = pnand %p2888_p6, %p41_p8  ;;  %s3266_s28 = int_to_ptr.vmem [resolvable:$true] %s192_s28 }
  0x33   : > { %s3268_s11 = scalar_lea.sflag [#allocation3], %s181_s6  ;;  %s2959_s12 = scalar_lea.hbm %s3260_s10, 256 }
  0x34   : > { %p2960_p13 = scmp.ne.s32.totalorder %s3260_s10, %s2959_s12  ;;  %p2961_p0 = pneg %p3262_p11 }
  0x35   : > { %s2964_s24 = scalar_lea.hbm %s4281_s0, 512  ;;  %p2965_p7 = scmp.lt.u32.totalorder %s3260_s10, %s4281_s0 }
  0x36   : > { %p2962_p3 = pnand %p2961_p0, %p2960_p13  ;;  %p2966_p9 = scmp.lt.u32.totalorder %s2964_s24, %s2959_s12 }
  0x37   : > { %p2968_p1 = scmp.lt.u32.totalorder %s2959_s12, %s3260_s10 }
  0x38   : > { %p2963_p5 = pneg %p2962_p3  ;;  %p2967_p2 = por %p2966_p9, %p2965_p7 }
  0x3a   : > { %p2969_p4 = por %p2968_p1, %p2967_p2 }
  0x3c   : > { %p2970_p6 = pnand %p2969_p4, %p2963_p5 }
  0x3e   : > { %2973 = shalt.err (!%p2970_p6)
}
  0x3f   : > { %s2974_s6 = scalar_lea.vmem %s3266_s28, 256  ;;  %s3124_s26 = smov [#allocation2]  }
  0x40   : > { %p2975_p8 = scmp.ne.s32.totalorder %s3266_s28, %s2974_s6  ;;  %s2979_s9 = sshll.u32 %s3124_s26, 4  ;;  %s2980_s9 = int_to_ptr.vmem [resolvable:$false] %s2979_s9 }
  0x41   : > { %s2981_s25 = scalar_lea.vmem %s2980_s9, 512  ;;  %p2982_p3 = scmp.lt.s32.totalorder %s3266_s28, %s2980_s9 }
  0x42   : > { %p2977_p10 = pnand %p2975_p8, %p2961_p0  ;;  %p2983_p7 = scmp.lt.s32.totalorder %s2981_s25, %s2974_s6 }
  0x44   : > { %p2978_p13 = pneg %p2977_p10  ;;  %p2984_p9 = por %p2983_p7, %p2982_p3 }
  0x46   : > { %p2985_p2 = pnand %p2984_p9, %p2978_p13 }
  0x48   : > { %2988 = shalt.err (!%p2985_p2)
}
  0x49   : > { %s3125_s12 = smov 128   ;;  %s3126_s13 = smov 8  }
  0x4a   : > { %2876 = dma.hbm_to_vmem [thread:$0]  (!%p3262_p11), %s3260_s10, 256, %s3266_s28, %s3268_s11, %s3125_s12, %s3125_s12, %s3126_s13  }
  0x4b   : > { %p4433_p0 = scmp.ne.s32.totalorder %s4428_s23, 0 }
  0x4d   : > { %204 = sbr.rel (%p4433_p0) target bundleno = 593 (0x251), region = 28 }
  0x54   : > { %s3299_s14 = sand.u32 1, %s3111_s16   ;;  %p4434_p5 = scmp.ne.s32.totalorder %s4426_s21, 0 }
  0x55   : > { %s3302_s24 = sshll.u32 %s3299_s14, 4  ;;  %s207_s7 = scalar_lea.sflag [#allocation3], %s3299_s14 }
  0x56   : > { %s210_s8 = scalar_lea.vmem [#allocation2], %s3302_s24 }
  0x57   : > { %3090 = dma.done.wait (%p4434_p5), %s207_s7, 256  }
  0x58   : > { %3092 = vsyncadd (%p4434_p5), %s207_s7, 4294967040  ;;  %p4435_p11 = scmp.eq.s32.totalorder %s3179_s19, 0 }
  0x5a   : > { %3094 = dma.done.wait (%p4435_p11), [#allocation6], 6144   ;;  %p4436_p1 = pmov %p4435_p11 }
  0x5b   : > { %v4293_v0 = vmov 0.0   ;;  %v256_v1 = vld [vmem:[#allocation5 + $0x8] sm:$0xff]  ;;  %v259_v2 = vld [vmem:[#allocation5 + $0x20] sm:$0xff]  ;;  %v3315_v3 = vld [vmem:[#allocation5 + $0x10] sm:$0xff]  ;;  %s234_s21 = scalar_lea.vmem [#allocation7], %s3302_s24  ;;  %s241_s10 = scalar_lea.vmem [#allocation8], %s3302_s24 }
  0x5c   : > { %3096 = vsyncadd (%p4436_p1), [#allocation6], 4294961152  ;;  %399 = vmatprep.mubr.f32.mxu0 %v4293_v0  ;;  %v303_v4 = vand.u32 4294901760, %v256_v1  ;;  %v307_v5 = vand.u32 4294901760, %v259_v2  ;;  %v3317_v6 = vld [vmem:[#allocation5 + $0x28] sm:$0xff]  ;;  %v4298_v7 = vand.u32 4294901760, %v3315_v3 }
  0x5d   : > { %v255_v8 = vld [vmem:[#allocation5] sm:$0xff]  ;;  %v258_v9 = vld [vmem:[#allocation5 + $0x18] sm:$0xff]  ;;  %v4297_v10 = vand.u32 4294901760, %v3317_v6  ;;  %v265_v14 = vld [vmem:[#allocation5 + $0x50] sm:$0xff]  ;;  %s1921_s23 = sshll.u32 %s234_s21, 4  ;;  %s1937_s28 = sshll.u32 %s241_s10, 4  ;;  %s4156_s23 = int_to_ptr.vmem [resolvable:$true] %s1921_s23  ;;  %s4160_s28 = int_to_ptr.vmem [resolvable:$true] %s1937_s28 }
  0x5e   : > { %v305_v11 = vand.u32 4294901760, %v255_v8  ;;  %v309_v12 = vand.u32 4294901760, %v258_v9  ;;  %v262_v13 = vld [vmem:[#allocation5 + $0x38] sm:$0xff]  ;;  %v3321_v15 = vld [vmem:[#allocation5 + $0x40] sm:$0xff]  ;;  %v3323_v16 = vpack.c.bf16 %v307_v5, %v303_v4  ;;  %v3325_v17 = vsub.f32 %v256_v1, %v303_v4  ;;  %v261_v21 = vld [vmem:[#allocation5 + $0x30] sm:$0xff]  ;;  %s248_s29 = scalar_lea.vmem [#allocation10], %s3302_s24 }
  0x5f   : > { %v3327_v18 = vsub.f32 %v259_v2, %v307_v5  ;;  %v311_v19 = vand.u32 4294901760, %v262_v13  ;;  %v3329_v20 = vld [vmem:[#allocation5 + $0x58] sm:$0xff]  ;;  %v264_v22 = vld [vmem:[#allocation5 + $0x48] sm:$0xff]  ;;  %v3335_v23 = vpack.c.bf16 %v4297_v10, %v4298_v7  ;;  %v271_v28 = vld [vmem:[#allocation5 + $0x80] sm:$0xff]  ;;  %v315_v30 = vand.u32 4294901760, %v265_v14  ;;  %s1953_s11 = sshll.u32 %s248_s29, 4  ;;  %s4173_s11 = int_to_ptr.vmem [resolvable:$true] %s1953_s11 }
  0x60   : > { %4437 = vst [vmem:[#allocation15_spill] sm:$0xff] %v3323_v16  ;;  %v3337_v24 = vpack.c.bf16 %v309_v12, %v305_v11  ;;  %v3339_v25 = vsub.f32 %v255_v8, %v305_v11  ;;  %v3341_v26 = vsub.f32 %v258_v9, %v309_v12  ;;  %v268_v27 = vld [vmem:[#allocation5 + $0x68] sm:$0xff]  ;;  %v3343_v29 = vld [vmem:[#allocation5 + $0x70] sm:$0xff]  ;;  %2444 = vmatprep.subr.bf16.mxu0 %v3323_v16  ;;  %v4296_v32 = vand.u32 4294901760, %v3321_v15  ;;  %v267_v39 = vld [vmem:[#allocation5 + $0x60] sm:$0xff]  ;;  %s2122_s6 = sshll.u32 %s3179_s19, 8 }
  0x61   : > { %4438 = vst [vmem:[#allocation16_spill] sm:$0xff] %v3327_v18  ;;  %4439 = vst [vmem:[#allocation17_spill] sm:$0xff] %v3335_v23  ;;  %v3346_v31 = vsub.f32 %v262_v13, %v311_v19  ;;  %v4295_v33 = vand.u32 4294901760, %v3329_v20  ;;  %v3350_v34 = vld [vmem:[#allocation5 + $0x88] sm:$0xff]  ;;  %2636 = vmatprep.subr.bf16.mxu1 %v3335_v23  ;;  %v313_v35 = vand.u32 4294901760, %v261_v21  ;;  %v317_v36 = vand.u32 4294901760, %v264_v22  ;;  %s4166_s12 = scalar_lea.hbm %s4283_s2, %s2122_s6  ;;  %s4171_s7 = scalar_lea.hbm %s4284_s3, %s2122_s6 }
  0x62   : > { %4440 = vst [vmem:[#allocation18_spill] sm:$0xff] %v3337_v24  ;;  %4441 = vst [vmem:[#allocation19_spill] sm:$0xff] %v3339_v25  ;;  %2446 = vmatpush1.bf16.msra.mxu0 %v3337_v24  ;;  %v319_v37 = vand.u32 4294901760, %v268_v27  ;;  %v323_v38 = vand.u32 4294901760, %v271_v28  ;;  %v270_v40 = vld [vmem:[#allocation5 + $0x78] sm:$0xff]  ;;  %2638 = vmatpush3.bf16.msra.mxu1 %v3335_v23  ;;  %v3355_v41 = vpack.c.bf16 %v315_v30, %v311_v19  ;;  %v4292_v44 = vand.u32 4294901760, %v3343_v29  ;;  %s4178_s26 = scalar_lea.hbm %s4285_s4, %s2122_s6 }
  0x63   : > { %v3357_v42 = vsub.f32 %v265_v14, %v315_v30  ;;  %v3363_v43 = vpack.c.bf16 %v4295_v33, %v4296_v32  ;;  %v274_v45 = vld [vmem:[#allocation5 + $0x98] sm:$0xff]  ;;  %v277_v46 = vld [vmem:[#allocation5 + $0xb0] sm:$0xff]  ;;  %v3366_v47 = vld [vmem:[#allocation5 + $0xa0] sm:$0xff]  ;;  %v3368_v48 = vpack.c.bf16 %v317_v36, %v313_v35  ;;  %v3370_v49 = vsub.f32 %v261_v21, %v313_v35  ;;  %s1898_s9 = scalar_lea.sflag [#allocation4], %s3299_s14  ;;  %s2989_s25 = scalar_lea.vmem %s4156_s23, 256 }
  0x64   : > { %4442 = vst [vmem:[#allocation20_spill] sm:$0xff] %v3355_v41  ;;  %v3372_v50 = vsub.f32 %v264_v22, %v317_v36  ;;  %v3374_v51 = vpack.c.bf16 %v323_v38, %v319_v37  ;;  %v3376_v52 = vld [vmem:[#allocation5 + $0xb8] sm:$0xff]  ;;  %v273_v53 = vld [vmem:[#allocation5 + $0x90] sm:$0xff]  ;;  %2448 = vmatprep.subr.bf16.mxu0 %v3355_v41  ;;  %v3380_v54 = vsub.f32 %v268_v27, %v319_v37  ;;  %v4291_v56 = vand.u32 4294901760, %v3350_v34  ;;  %v276_v62 = vld [vmem:[#allocation5 + $0xa8] sm:$0xff]  ;;  %p2990_p4 = scmp.ne.s32.totalorder %s4156_s23, %s2989_s25 }
  0x65   : > { %4443 = vst [vmem:[#allocation21_spill] sm:$0xff] %v3363_v43  ;;  %4444 = vst [vmem:[#allocation22_spill] sm:$0xff] %v3368_v48  ;;  %2640 = vmatprep.subr.bf16.mxu1 %v3363_v43  ;;  %v3382_v55 = vsub.f32 %v271_v28, %v323_v38  ;;  %v321_v57 = vand.u32 4294901760, %v267_v39  ;;  %v325_v58 = vand.u32 4294901760, %v270_v40  ;;  %v327_v59 = vand.u32 4294901760, %v274_v45  ;;  %v280_v63 = vld [vmem:[#allocation5 + $0xc8] sm:$0xff] }
  0x66   : > { %4445 = vst [vmem:[#allocation23_spill] sm:$0xff] %v3374_v51  ;;  %2450 = vmatpush1.bf16.msra.mxu0 %v3368_v48  ;;  %v331_v60 = vand.u32 4294901760, %v277_v46  ;;  %v4290_v61 = vand.u32 4294901760, %v3366_v47  ;;  %2642 = vmatpush3.bf16.msra.mxu1 %v3363_v43  ;;  %v3393_v1 = vpack.c.bf16 %v4291_v56, %v4292_v44  ;;  %v4289_v4 = vand.u32 4294901760, %v3376_v52  ;;  %v283_v8 = vld [vmem:[#allocation5 + $0xe0] sm:$0xff]  ;;  %v3398_v9 = vld [vmem:[#allocation5 + $0xd0] sm:$0xff]  ;;  %p2991_p6 = pnand %p2990_p4, %p3251_p12 }
  0x67   : > { %2452 = vmatprep.subr.bf16.mxu0 %v3374_v51  ;;  %v3395_v2 = vsub.f32 %v267_v39, %v321_v57  ;;  %v329_v5 = vand.u32 4294901760, %v273_v53  ;;  %v3400_v11 = vld [vmem:[#allocation5 + $0xe8] sm:$0xff]  ;;  %v3402_v12 = vpack.c.bf16 %v325_v58, %v321_v57  ;;  %v3404_v13 = vsub.f32 %v270_v40, %v325_v58  ;;  %v279_v21 = vld [vmem:[#allocation5 + $0xc0] sm:$0xff]  ;;  %v282_v22 = vld [vmem:[#allocation5 + $0xd8] sm:$0xff] }
  0x68   : > { %4446 = vst [vmem:[#allocation24_spill] sm:$0xff] %v3393_v1  ;;  %v3406_v14 = vpack.c.bf16 %v331_v60, %v327_v59  ;;  %v3408_v19 = vsub.f32 %v274_v45, %v327_v59  ;;  %2644 = vmatprep.subr.bf16.mxu1 %v3393_v1  ;;  %v3411_v27 = vsub.f32 %v277_v46, %v331_v60  ;;  %v333_v30 = vand.u32 4294901760, %v276_v62  ;;  %v286_v40 = vld [vmem:[#allocation5 + $0xf8] sm:$0xff]  ;;  %v289_v45 = vld [vmem:[#allocation5 + $0x110] sm:$0xff]  ;;  %v3430_v59 = vld [vmem:[#allocation5 + $0x100] sm:$0xff]  ;;  %p2992_p8 = pneg %p2991_p6 }
  0x69   : > { %4447 = vst [vmem:[#allocation25_spill] sm:$0xff] %v3402_v12  ;;  %v3417_v28 = vpack.c.bf16 %v4289_v4, %v4290_v61  ;;  %v3419_v35 = vsub.f32 %v273_v53, %v329_v5  ;;  %v335_v36 = vand.u32 4294901760, %v280_v63  ;;  %v339_v37 = vand.u32 4294901760, %v283_v8  ;;  %v3432_v60 = vld [vmem:[#allocation5 + $0x118] sm:$0xff]  ;;  %v285_v4 = vld [vmem:[#allocation5 + $0xf0] sm:$0xff]  ;;  %v295_v0 = vld [vmem:[#allocation5 + $0x140] sm:$0xff] }
  0x6a   : > { %4448 = vst [vmem:[#allocation26_spill] sm:$0xff] %v3406_v14  ;;  %2454 = vmatpush1.bf16.msra.mxu0 %v3402_v12  ;;  %v4300_v38 = vand.u32 4294901760, %v3398_v9  ;;  %v4299_v39 = vand.u32 4294901760, %v3400_v11  ;;  %2646 = vmatpush3.bf16.msra.mxu1 %v3393_v1  ;;  %v3426_v46 = vpack.c.bf16 %v333_v30, %v329_v5  ;;  %v3428_v57 = vsub.f32 %v276_v62, %v333_v30  ;;  %v288_v5 = vld [vmem:[#allocation5 + $0x108] sm:$0xff]  ;;  %v298_v1 = vld [vmem:[#allocation5 + $0x158] sm:$0xff]  ;;  %v301_v51 = vld [vmem:[#allocation5 + $0x170] sm:$0xff] }
  0x6b   : > { %4449 = vst [vmem:[#allocation27_spill] sm:$0xff] %v3417_v28  ;;  %2456 = vmatprep.subr.bf16.mxu0 %v3406_v14  ;;  %v337_v53 = vand.u32 4294901760, %v279_v21  ;;  %v341_v58 = vand.u32 4294901760, %v282_v22  ;;  %2648 = vmatprep.subr.bf16.mxu1 %v3417_v28  ;;  %v3435_v61 = vpack.c.bf16 %v339_v37, %v335_v36  ;;  %v3437_v56 = vsub.f32 %v280_v63, %v335_v36  ;;  %v292_v30 = vld [vmem:[#allocation5 + $0x128] sm:$0xff]  ;;  %v294_v14 = vld [vmem:[#allocation5 + $0x138] sm:$0xff]  ;;  %v3477_v48 = vld [vmem:[#allocation5 + $0x160] sm:$0xff] }
  0x6c   : > { %4450 = vst [vmem:[#allocation28_spill] sm:$0xff] %v3426_v46  ;;  %v3439_v44 = vsub.f32 %v283_v8, %v339_v37  ;;  %v3445_v62 = vpack.c.bf16 %v4299_v39, %v4300_v38  ;;  %v343_v7 = vand.u32 4294901760, %v286_v40  ;;  %v347_v63 = vand.u32 4294901760, %v289_v45  ;;  %v3456_v39 = vld [vmem:[#allocation5 + $0x130] sm:$0xff]  ;;  %v300_v23 = vld [vmem:[#allocation5 + $0x168] sm:$0xff] }
  0x6d   : > { %4451 = vst [vmem:[#allocation29_spill] sm:$0xff] %v3435_v61  ;;  %v3447_v33 = vpack.c.bf16 %v341_v58, %v337_v53  ;;  %v3449_v32 = vsub.f32 %v279_v21, %v337_v53  ;;  %v3451_v10 = vsub.f32 %v282_v22, %v341_v58  ;;  %v345_v37 = vand.u32 4294901760, %v285_v4  ;;  %v3462_v58 = vld [vmem:[#allocation5 + $0x148] sm:$0xff]  ;;  %v297_v24 = vld [vmem:[#allocation5 + $0x150] sm:$0xff] }
  0x6e   : > { %4452 = vst [vmem:[#allocation30_spill] sm:$0xff] %v3445_v62  ;;  %2458 = vmatpush1.bf16.msra.mxu0 %v3426_v46  ;;  %2650 = vmatpush3.bf16.msra.mxu1 %v3417_v28  ;;  %v3460_v38 = vsub.f32 %v286_v40, %v343_v7  ;;  %v349_v21 = vand.u32 4294901760, %v288_v5  ;;  %v351_v22 = vand.u32 4294901760, %v292_v30  ;;  %v355_v53 = vand.u32 4294901760, %v295_v0  ;;  %4454 = vst [vmem:[#allocation32_spill] sm:$0xff] %v3462_v58  ;;  %v291_v46 = vld [vmem:[#allocation5 + $0x120] sm:$0xff] }
  0x6f   : > { %4453 = vst [vmem:[#allocation31_spill] sm:$0xff] %v3447_v33  ;;  %2460 = vmatprep.subr.bf16.mxu0 %v3435_v61  ;;  %2652 = vmatprep.subr.bf16.mxu1 %v3445_v62  ;;  %v3465_v8 = vpack.c.bf16 %v347_v63, %v343_v7  ;;  %v3467_v36 = vsub.f32 %v289_v45, %v347_v63  ;;  %v4456_v12 = vand.u32 4294901760, %v3430_v59  ;;  %v4457_v28 = vand.u32 4294901760, %v3432_v60  ;;  %v3487_v63 = vld [vmem:[#allocation5 + $0x178] sm:$0xff] }
  0x70   : > { %v3475_v40 = vsub.f32 %v285_v4, %v345_v37  ;;  %v3479_v43 = vpack.c.bf16 %v349_v21, %v345_v37  ;;  %v3481_v41 = vsub.f32 %v288_v5, %v349_v21  ;;  %v3483_v7 = vpack.c.bf16 %v355_v53, %v351_v22 }
  0x71   : > { %4455 = vst [vmem:[#allocation33_spill] sm:$0xff] %v3465_v8  ;;  %v3473_v61 = vpack.c.bf16 %v4457_v28, %v4456_v12  ;;  %v3485_v45 = vsub.f32 %v292_v30, %v351_v22  ;;  %v3490_v12 = vsub.f32 %v295_v0, %v355_v53  ;;  %v4336_v4 = vand.u32 4294901760, %v3456_v39 }
  0x72   : > { %4459 = vst [vmem:[#allocation35_spill] sm:$0xff] %v3479_v43  ;;  %4460 = vst [vmem:[#allocation36_spill] sm:$0xff] %v3481_v41  ;;  %2462 = vmatpush1.bf16.msra.mxu0 %v3447_v33  ;;  %v4335_v28 = vand.u32 4294901760, %v3462_v58  ;;  %v353_v37 = vand.u32 4294901760, %v291_v46  ;;  %2654 = vmatpush3.bf16.msra.mxu1 %v3445_v62  ;;  %v357_v5 = vand.u32 4294901760, %v294_v14  ;;  %v359_v30 = vand.u32 4294901760, %v298_v1 }
  0x73   : > { %4458 = vst [vmem:[#allocation34_spill] sm:$0xff] %v3473_v61  ;;  %4461 = vst [vmem:[#allocation37_spill] sm:$0xff] %v3483_v7  ;;  %2464 = vmatprep.subr.bf16.mxu0 %v3465_v8  ;;  %v363_v21 = vand.u32 4294901760, %v301_v51  ;;  %2656 = vmatprep.subr.bf16.mxu1 %v3473_v61  ;;  %v4340_v33 = vand.u32 4294901760, %v3487_v63  ;;  %v361_v62 = vand.u32 4294901760, %v297_v24  ;;  %v253_v8 = vld [vmem:[%s210_s8] sm:$0xff] }
  0x74   : > { %4462 = vst [vmem:[#allocation38_spill] sm:$0xff] %v3485_v45  ;;  %4463 = vst [vmem:[#allocation39_spill] sm:$0xff] %v3490_v12  ;;  %v3502_v0 = vpack.c.bf16 %v4335_v28, %v4336_v4  ;;  %v3504_v53 = vsub.f32 %v291_v46, %v353_v37  ;;  %v3509_v16 = vpack.c.bf16 %v357_v5, %v353_v37  ;;  %v4468_v46 = vand.u32 4294901760, %v3477_v48 }
  0x75   : > { %v3511_v22 = vsub.f32 %v294_v14, %v357_v5  ;;  %v3513_v12 = vpack.c.bf16 %v363_v21, %v359_v30  ;;  %v3515_v45 = vsub.f32 %v298_v1, %v359_v30  ;;  %v3518_v28 = vsub.f32 %v301_v51, %v363_v21  ;;  %v254_v30 = vld [vmem:[%s210_s8 + $0x8] sm:$0xff] }
  0x76   : > { %4464 = vst [vmem:[#allocation40_spill] sm:$0xff] %v3502_v0  ;;  %4465 = vst [vmem:[#allocation41_spill] sm:$0xff] %v3504_v53  ;;  %2466 = vmatpush1.bf16.msra.mxu0 %v3479_v43  ;;  %v3524_v4 = vpack.c.bf16 %v4340_v33, %v4468_v46  ;;  %v365_v53 = vand.u32 4294901760, %v300_v23  ;;  %v3526_v58 = vsub.f32 %v297_v24, %v361_v62  ;;  %2658 = vmatpush3.bf16.msra.mxu1 %v3473_v61 }
  0x77   : > { %4466 = vst [vmem:[#allocation42_spill] sm:$0xff] %v3509_v16  ;;  %4467 = vst [vmem:[#allocation43_spill] sm:$0xff] %v3513_v12  ;;  %2468 = vmatprep.subr.bf16.mxu0 %v3483_v7  ;;  %v4343_v1 = vand.u32 4294901760, %v3325_v17  ;;  %v3532_v37 = vand.u32 4294901760, %v253_v8  ;;  %v4472_v51 = vand.u32 4294901760, %v3315_v3  ;;  %2660 = vmatprep.subr.bf16.mxu1 %v3502_v0  ;;  %v4475_v46 = vand.u32 4294901760, %v3317_v6 }
  0x78   : > { %4469 = vst [vmem:[#allocation44_spill] sm:$0xff] %v3524_v4  ;;  %4470 = vst [vmem:[#allocation45_spill] sm:$0xff] %v3526_v58  ;;  %v3542_v24 = vpack.c.bf16 %v365_v53, %v361_v62  ;;  %v3544_v21 = vsub.f32 %v300_v23, %v365_v53  ;;  %v4346_v14 = vand.u32 4294901760, %v3339_v25 }
  0x79   : > { %4471 = vst [vmem:[#allocation46_spill] sm:$0xff] %v3532_v37  ;;  %v3537_v5 = vsub.f32 %v3315_v3, %v4472_v51  ;;  %v3549_v33 = vsub.f32 %v3317_v6, %v4475_v46  ;;  %v425_v3 = vsub.f32 %v3325_v17, %v4343_v1  ;;  %v4476_v51 = vand.u32 4294901760, %v3327_v18 }
  0x7a   : > { %4474 = vst [vmem:[#allocation48_spill] sm:$0xff] %v3542_v24  ;;  %v3559_v62 = vsub.f32 %v253_v8, %v3532_v37  ;;  %2470 = vmatpush1.bf16.msra.mxu0 %v3509_v16  ;;  %v431_v53 = vsub.f32 %v3339_v25, %v4346_v14  ;;  %v3568_v1 = vand.u32 4294901760, %v254_v30  ;;  %2662 = vmatpush3.bf16.msra.mxu1 %v3502_v0  ;;  %v4482_v0 = vand.u32 4294901760, %v3341_v26 }
  0x7b   : > { %4473 = vst [vmem:[#allocation47_spill] sm:$0xff] %v3537_v5  ;;  %v437_v7 = vsub.f32 %v3327_v18, %v4476_v51  ;;  %2472 = vmatprep.subr.bf16.mxu0 %v3513_v12  ;;  %v426_v8 = vand.u32 4294901760, %v425_v3  ;;  %v4480_v16 = vand.u32 4294901760, %v3537_v5  ;;  %2664 = vmatprep.subr.bf16.mxu1 %v3524_v4  ;;  %v4481_v14 = vand.u32 4294901760, %v3549_v33 }
  0x7c   : > { %4477 = vst [vmem:[#allocation49_spill] sm:$0xff] %v3559_v62  ;;  %4478 = vst [vmem:[#allocation50_spill] sm:$0xff] %v3568_v1  ;;  %v3573_v23 = vand.u32 4294901760, %v3559_v62  ;;  %v432_v43 = vand.u32 4294901760, %v431_v53  ;;  %v443_v12 = vsub.f32 %v3341_v26, %v4482_v0 }
  0x7d   : > { %v438_v51 = vand.u32 4294901760, %v437_v7  ;;  %v1312_v6 = vsub.f32 %v3537_v5, %v4480_v16  ;;  %v1319_v46 = vsub.f32 %v3549_v33, %v4481_v14  ;;  %v3586_v7 = vsub.f32 %v254_v30, %v3568_v1 }
  0x7e   : > { %4479 = vst [vmem:[#allocation51_spill] sm:$0xff] %v3573_v23  ;;  %v403_v61 = vsub.f32 %v3559_v62, %v3573_v23  ;;  %v4363_v16 = vand.u32 4294901760, %v3346_v31  ;;  %2474 = vmatpush1.bf16.msra.mxu0 %v3542_v24  ;;  %v444_v18 = vand.u32 4294901760, %v443_v12  ;;  %2666 = vmatpush3.bf16.msra.mxu1 %v3524_v4  ;;  %v4486_v12 = vand.u32 4294901760, %v3329_v20 }
  0x7f   : > { %4483 = vst [vmem:[#allocation52_spill] sm:$0xff] %v3586_v7  ;;  %v2475_v3 = vpack.c.bf16 %v438_v51, %v426_v8  ;;  %v1313_v25 = vand.u32 4294901760, %v1312_v6  ;;  %v1320_v5 = vand.u32 4294901760, %v1319_v46  ;;  %v3593_v14 = vand.u32 4294901760, %v3586_v7 }
  0x80   : > { %v404_v0 = vand.u32 4294901760, %v403_v61  ;;  %v449_v30 = vsub.f32 %v3346_v31, %v4363_v16  ;;  %v4485_v6 = vand.u32 4294901760, %v3321_v15  ;;  %v3608_v46 = vsub.f32 %v3329_v20, %v4486_v12 }
  0x81   : > { %4484 = vst [vmem:[#allocation53_spill] sm:$0xff] %v3593_v14  ;;  %2476 = vmatprep.subr.bf16.mxu0 %v2475_v3  ;;  %v2667_v51 = vpack.c.bf16 %v1320_v5, %v1313_v25  ;;  %v2477_v53 = vpack.c.bf16 %v444_v18, %v432_v43  ;;  %v414_v3 = vsub.f32 %v3586_v7, %v3593_v14  ;;  %v4487_v61 = vand.u32 4294901760, %v3357_v42 }
  0x82   : > { %v3603_v8 = vsub.f32 %v3321_v15, %v4485_v6  ;;  %2265 = vmatprep.mubr.f32.mxu1 %v404_v0  ;;  %405 = vmatmul.mubr.f32.vlgmr.msra.gmra.mrb[0].mxu0 %v404_v0  ;;  %v450_v16 = vand.u32 4294901760, %v449_v30  ;;  %v4366_v6 = vand.u32 4294901760, %v3608_v46  ;;  %v4368_v4 = vand.u32 4294901760, %v3370_v49 }
  0x83   : > { %v461_v24 = vsub.f32 %v3357_v42, %v4487_v61  ;;  %2668 = vmatprep.subr.bf16.mxu1 %v2667_v51  ;;  %2478 = vmatpush1.bf16.msra.mxu0 %v2477_v53  ;;  %v415_v20 = vand.u32 4294901760, %v414_v3  ;;  %v4373_v25 = vand.u32 4294901760, %v3372_v50  ;;  %v4376_v43 = vand.u32 4294901760, %v3380_v54 }
  0x84   : > { %v4367_v15 = vand.u32 4294901760, %v3603_v8  ;;  %v1333_v0 = vsub.f32 %v3608_v46, %v4366_v6  ;;  %v455_v30 = vsub.f32 %v3370_v49, %v4368_v4  ;;  %v4488_v12 = vmov 0.0  }
  0x85   : > { %v462_v18 = vand.u32 4294901760, %v461_v24  ;;  %410 = vmatprep.mubr.f32.mxu0 %v4488_v12  ;;  %2266 = vmatmul.mubr.f32.vlgmr.msra.gmra.mrb[0].mxu1 %v415_v20  ;;  %v467_v3 = vsub.f32 %v3372_v50, %v4373_v25  ;;  %v473_v61 = vsub.f32 %v3380_v54, %v4376_v43  ;;  %v4489_v6 = vand.u32 4294901760, %v3343_v29 }
  0x86   : > { %v1326_v5 = vsub.f32 %v3603_v8, %v4367_v15  ;;  %2670 = vmatpush3.bf16.msra.mxu1 %v2667_v51  ;;  %v1334_v53 = vand.u32 4294901760, %v1333_v0  ;;  %v456_v14 = vand.u32 4294901760, %v455_v30  ;;  %v4490_v23 = vand.u32 4294901760, %v3382_v55  ;;  %416 = vmatmul.mubr.f32.gmra.mrb[2].mxu0 %v415_v20 }
  0x87   : > { %v2479_v24 = vpack.c.bf16 %v462_v18, %v450_v16  ;;  %v3640_v15 = vsub.f32 %v3343_v29, %v4489_v6  ;;  %v468_v18 = vand.u32 4294901760, %v467_v3  ;;  %v474_v25 = vand.u32 4294901760, %v473_v61  ;;  %646 = vmatprep.mubr.f32.mxu0 %v4488_v12  ;;  %2300 = vmatprep.mubr.f32.mxu1 %v3532_v37 }
  0x88   : > { %v1327_v4 = vand.u32 4294901760, %v1326_v5  ;;  %v485_v16 = vsub.f32 %v3382_v55, %v4490_v23  ;;  %v4491_v43 = vand.u32 4294901760, %v3350_v34  ;;  %v4381_v6 = vand.u32 4294901760, %v3395_v2 }
  0x89   : > { %2480 = vmatprep.subr.bf16.mxu0 %v2479_v24  ;;  %v4400_v7 = vand.u32 4294901760, %v3640_v15  ;;  %v4379_v5 = vand.u32 4294901760, %v3404_v13  ;;  %v2481_v23 = vpack.c.bf16 %v468_v18, %v456_v14  ;;  %v4382_v14 = vand.u32 4294901760, %v3411_v27 }
  0x8a   : > { %v3649_v62 = vsub.f32 %v3350_v34, %v4491_v43  ;;  %v2671_v29 = vpack.c.bf16 %v1334_v53, %v1327_v4  ;;  %v486_v51 = vand.u32 4294901760, %v485_v16  ;;  %v4380_v34 = vand.u32 4294901760, %v3408_v19 }
  0x8b   : > { %v1340_v20 = vsub.f32 %v3640_v15, %v4400_v7  ;;  %v479_v4 = vsub.f32 %v3395_v2, %v4381_v6  ;;  %v491_v30 = vsub.f32 %v3404_v13, %v4379_v5  ;;  %2482 = vmatpush1.bf16.msra.mxu0 %v2481_v23  ;;  %v4492_v3 = vand.u32 4294901760, %v3366_v47 }
  0x8c   : > { %v4397_v0 = vand.u32 4294901760, %v3649_v62  ;;  %2672 = vmatprep.subr.bf16.mxu1 %v2671_v29  ;;  %v2483_v43 = vpack.c.bf16 %v486_v51, %v474_v25  ;;  %v497_v25 = vsub.f32 %v3408_v19, %v4380_v34  ;;  %v4493_v51 = vand.u32 4294901760, %v3376_v52 }
  0x8d   : > { %2674 = vmatpush3.bf16.msra.mxu1 %v2671_v29  ;;  %v1341_v53 = vand.u32 4294901760, %v1340_v20  ;;  %v3676_v61 = vsub.f32 %v3366_v47, %v4492_v3  ;;  %v480_v16 = vand.u32 4294901760, %v479_v4  ;;  %v492_v18 = vand.u32 4294901760, %v491_v30 }
  0x8e   : > { %v1347_v24 = vsub.f32 %v3649_v62, %v4397_v0  ;;  %2484 = vmatprep.subr.bf16.mxu0 %v2483_v43  ;;  %v509_v29 = vsub.f32 %v3411_v27, %v4382_v14  ;;  %v3684_v23 = vsub.f32 %v3376_v52, %v4493_v51  ;;  %v498_v5 = vand.u32 4294901760, %v497_v25 }
  0x8f   : > { %v4387_v34 = vand.u32 4294901760, %v3676_v61  ;;  %v4383_v6 = vand.u32 4294901760, %v3419_v35  ;;  %v2485_v47 = vpack.c.bf16 %v492_v18, %v480_v16  ;;  %v4384_v4 = vand.u32 4294901760, %v3428_v57 }
  0x90   : > { %v1348_v20 = vand.u32 4294901760, %v1347_v24  ;;  %v510_v3 = vand.u32 4294901760, %v509_v29  ;;  %v4385_v43 = vand.u32 4294901760, %v3684_v23  ;;  %v4386_v24 = vand.u32 4294901760, %v3437_v56 }
  0x91   : > { %v1354_v14 = vsub.f32 %v3676_v61, %v4387_v34  ;;  %v503_v52 = vsub.f32 %v3419_v35, %v4383_v6  ;;  %2486 = vmatpush1.bf16.msra.mxu0 %v2485_v47  ;;  %v4392_v18 = vand.u32 4294901760, %v3439_v44  ;;  %v4494_v47 = vand.u32 4294901760, %v3398_v9 }
  0x92   : > { %v2675_v30 = vpack.c.bf16 %v1348_v20, %v1341_v53  ;;  %v2487_v25 = vpack.c.bf16 %v510_v3, %v498_v5  ;;  %v1361_v16 = vsub.f32 %v3684_v23, %v4385_v43  ;;  %v515_v53 = vsub.f32 %v3428_v57, %v4384_v4 }
  0x93   : > { %v1355_v29 = vand.u32 4294901760, %v1354_v14  ;;  %v504_v51 = vand.u32 4294901760, %v503_v52  ;;  %v521_v20 = vsub.f32 %v3437_v56, %v4386_v24  ;;  %v3710_v5 = vsub.f32 %v3398_v9, %v4494_v47 }
  0x94   : > { %2676 = vmatprep.subr.bf16.mxu1 %v2675_v30  ;;  %2488 = vmatprep.subr.bf16.mxu0 %v2487_v25  ;;  %v1362_v3 = vand.u32 4294901760, %v1361_v16  ;;  %v516_v6 = vand.u32 4294901760, %v515_v53  ;;  %v533_v4 = vsub.f32 %v3439_v44, %v4392_v18  ;;  %v4495_v14 = vand.u32 4294901760, %v3400_v11 }
  0x95   : > { %2678 = vmatpush3.bf16.msra.mxu1 %v2675_v30  ;;  %v522_v43 = vand.u32 4294901760, %v521_v20  ;;  %v4389_v24 = vand.u32 4294901760, %v3710_v5  ;;  %v4388_v34 = vand.u32 4294901760, %v3449_v32  ;;  %v4390_v9 = vand.u32 4294901760, %v3451_v10 }
  0x96   : > { %v3718_v52 = vsub.f32 %v3400_v11, %v4495_v14  ;;  %v2679_v30 = vpack.c.bf16 %v1362_v3, %v1355_v29  ;;  %v2489_v25 = vpack.c.bf16 %v516_v6, %v504_v51  ;;  %v534_v16 = vand.u32 4294901760, %v533_v4 }
  0x97   : > { %v1368_v47 = vsub.f32 %v3710_v5, %v4389_v24  ;;  %v527_v11 = vsub.f32 %v3449_v32, %v4388_v34  ;;  %v539_v20 = vsub.f32 %v3451_v10, %v4390_v9  ;;  %v4395_v14 = vand.u32 4294901760, %v3460_v38 }
  0x98   : > { %v4391_v53 = vand.u32 4294901760, %v3718_v52  ;;  %2680 = vmatprep.subr.bf16.mxu1 %v2679_v30  ;;  %2490 = vmatpush1.bf16.msra.mxu0 %v2489_v25  ;;  %v2491_v6 = vpack.c.bf16 %v534_v16, %v522_v43  ;;  %v4393_v29 = vand.u32 4294901760, %v3467_v36  ;;  %v4496_v51 = vand.u32 4294901760, %v3430_v59 }
  0x99   : > { %2682 = vmatpush3.bf16.msra.mxu1 %v2679_v30  ;;  %v1369_v34 = vand.u32 4294901760, %v1368_v47  ;;  %v528_v24 = vand.u32 4294901760, %v527_v11  ;;  %v540_v9 = vand.u32 4294901760, %v539_v20  ;;  %v545_v25 = vsub.f32 %v3460_v38, %v4395_v14 }
  0x9a   : > { %v1375_v4 = vsub.f32 %v3718_v52, %v4391_v53  ;;  %v3741_v3 = vsub.f32 %v3430_v59, %v4496_v51  ;;  %2492 = vmatprep.subr.bf16.mxu0 %v2491_v6  ;;  %v557_v16 = vsub.f32 %v3467_v36, %v4393_v29  ;;  %v4497_v18 = vand.u32 4294901760, %v3432_v60 }
  0x9b   : > { %v2493_v30 = vpack.c.bf16 %v540_v9, %v528_v24  ;;  %v546_v47 = vand.u32 4294901760, %v545_v25  ;;  %v4396_v11 = vand.u32 4294901760, %v3475_v40  ;;  %v4398_v20 = vand.u32 4294901760, %v3481_v41  ;;  %v4499_v25 = vld [vmem:[#allocation39_spill] sm:$0xff] }
  0x9c   : > { %v1376_v43 = vand.u32 4294901760, %v1375_v4  ;;  %v4394_v53 = vand.u32 4294901760, %v3741_v3  ;;  %v3753_v59 = vsub.f32 %v3432_v60, %v4497_v18  ;;  %v558_v6 = vand.u32 4294901760, %v557_v16  ;;  %v4498_v18 = vld [vmem:[#allocation38_spill] sm:$0xff] }
  0x9d   : > { %2494 = vmatpush1.bf16.msra.mxu0 %v2493_v30  ;;  %v551_v60 = vsub.f32 %v3475_v40, %v4396_v11  ;;  %v563_v24 = vsub.f32 %v3481_v41, %v4398_v20  ;;  %v4403_v9 = vand.u32 4294901760, %v4498_v18  ;;  %v4500_v30 = vand.u32 4294901760, %v3456_v39 }
  0x9e   : > { %v2683_v51 = vpack.c.bf16 %v1376_v43, %v1369_v34  ;;  %v1382_v4 = vsub.f32 %v3741_v3, %v4394_v53  ;;  %v4399_v29 = vand.u32 4294901760, %v3753_v59  ;;  %v4405_v34 = vand.u32 4294901760, %v4499_v25 }
  0x9f   : > { %v2495_v43 = vpack.c.bf16 %v558_v6, %v546_v47  ;;  %v3775_v14 = vsub.f32 %v3456_v39, %v4500_v30  ;;  %v552_v11 = vand.u32 4294901760, %v551_v60  ;;  %v564_v0 = vand.u32 4294901760, %v563_v24 }
  0xa0   : > { %2684 = vmatprep.subr.bf16.mxu1 %v2683_v51  ;;  %v1383_v16 = vand.u32 4294901760, %v1382_v4  ;;  %v1389_v53 = vsub.f32 %v3753_v59, %v4399_v29  ;;  %v569_v20 = vsub.f32 %v4498_v18, %v4403_v9  ;;  %v581_v47 = vsub.f32 %v4499_v25, %v4405_v34  ;;  %v4501_v29 = vld [vmem:[#allocation32_spill] sm:$0xff] }
  0xa1   : > { %2686 = vmatpush3.bf16.msra.mxu1 %v2683_v51  ;;  %2496 = vmatprep.subr.bf16.mxu0 %v2495_v43  ;;  %v4410_v4 = vand.u32 4294901760, %v3775_v14  ;;  %v4502_v7 = vand.u32 4294901760, %v4501_v29  ;;  %v4503_v51 = vld [vmem:[#allocation41_spill] sm:$0xff]  ;;  %v2497_v24 = vpack.c.bf16 %v564_v0, %v552_v11  ;;  %v4406_v9 = vand.u32 4294901760, %v3511_v22 }
  0xa2   : > { %v1390_v6 = vand.u32 4294901760, %v1389_v53  ;;  %v4407_v60 = vand.u32 4294901760, %v4503_v51  ;;  %v570_v30 = vand.u32 4294901760, %v569_v20  ;;  %v582_v41 = vand.u32 4294901760, %v581_v47 }
  0xa3   : > { %v3787_v39 = vsub.f32 %v4501_v29, %v4502_v7  ;;  %v1396_v43 = vsub.f32 %v3775_v14, %v4410_v4  ;;  %2498 = vmatpush1.bf16.msra.mxu0 %v2497_v24  ;;  %v587_v0 = vsub.f32 %v3511_v22, %v4406_v9  ;;  %v4409_v29 = vand.u32 4294901760, %v3515_v45 }
  0xa4   : > { %v2687_v18 = vpack.c.bf16 %v1390_v6, %v1383_v16  ;;  %v575_v34 = vsub.f32 %v4503_v51, %v4407_v60  ;;  %v2499_v7 = vpack.c.bf16 %v582_v41, %v570_v30  ;;  %v4411_v11 = vand.u32 4294901760, %v3518_v28 }
  0xa5   : > { %v4408_v53 = vand.u32 4294901760, %v3787_v39  ;;  %v1397_v20 = vand.u32 4294901760, %v1396_v43  ;;  %v4504_v6 = vand.u32 4294901760, %v3477_v48  ;;  %v588_v41 = vand.u32 4294901760, %v587_v0 }
  0xa6   : > { %2688 = vmatprep.subr.bf16.mxu1 %v2687_v18  ;;  %v576_v47 = vand.u32 4294901760, %v575_v34  ;;  %2500 = vmatprep.subr.bf16.mxu0 %v2499_v7  ;;  %v593_v30 = vsub.f32 %v3515_v45, %v4409_v29  ;;  %v605_v43 = vsub.f32 %v3518_v28, %v4411_v11  ;;  %v4506_v9 = vand.u32 4294901760, %v3487_v63 }
  0xa7   : > { %v1403_v16 = vsub.f32 %v3787_v39, %v4408_v53  ;;  %v3809_v24 = vsub.f32 %v3477_v48, %v4504_v6  ;;  %2690 = vmatpush3.bf16.msra.mxu1 %v2687_v18  ;;  %v4412_v18 = vand.u32 4294901760, %v3526_v58  ;;  %v4418_v7 = vand.u32 4294901760, %v3544_v21 }
  0xa8   : > { %v3820_v34 = vsub.f32 %v3487_v63, %v4506_v9  ;;  %v2501_v0 = vpack.c.bf16 %v588_v41, %v576_v47  ;;  %v594_v6 = vand.u32 4294901760, %v593_v30  ;;  %v606_v53 = vand.u32 4294901760, %v605_v43  ;;  %v4507_v43 = vld [vmem:[#allocation16_spill] sm:$0xff] }
  0xa9   : > { %4505 = vst [vmem:[#allocation39_spill] sm:$0xff] %v3809_v24  ;;  %v1404_v60 = vand.u32 4294901760, %v1403_v16  ;;  %v4413_v48 = vand.u32 4294901760, %v3809_v24  ;;  %v599_v63 = vsub.f32 %v3526_v58, %v4412_v18  ;;  %v611_v9 = vsub.f32 %v3544_v21, %v4418_v7 }
  0xaa   : > { %v4419_v29 = vand.u32 4294901760, %v3820_v34  ;;  %2502 = vmatpush1.bf16.msra.mxu0 %v2501_v0  ;;  %v2503_v16 = vpack.c.bf16 %v606_v53, %v594_v6  ;;  %v2507_v18 = vpack.c.bf16 %v4507_v43, %v3325_v17  ;;  %v4509_v53 = vld [vmem:[#allocation19_spill] sm:$0xff] }
  0xab   : > { %v2691_v4 = vpack.c.bf16 %v1404_v60, %v1397_v20  ;;  %v1410_v11 = vsub.f32 %v3809_v24, %v4413_v48  ;;  %v600_v20 = vand.u32 4294901760, %v599_v63  ;;  %v612_v41 = vand.u32 4294901760, %v611_v9  ;;  %v4508_v24 = vld [vmem:[#allocation47_spill] sm:$0xff] }
  0xac   : > { %v1417_v47 = vsub.f32 %v3820_v34, %v4419_v29  ;;  %2504 = vmatprep.subr.bf16.mxu0 %v2503_v16  ;;  %v2699_v0 = vpack.c.bf16 %v3549_v33, %v4508_v24  ;;  %v2509_v6 = vpack.c.bf16 %v3341_v26, %v4509_v53  ;;  %v2513_v63 = vpack.c.bf16 %v3372_v50, %v3370_v49 }
  0xad   : > { %2692 = vmatprep.subr.bf16.mxu1 %v2691_v4  ;;  %v1411_v60 = vand.u32 4294901760, %v1410_v11  ;;  %v2505_v48 = vpack.c.bf16 %v612_v41, %v600_v20  ;;  %v2511_v11 = vpack.c.bf16 %v3357_v42, %v3346_v31  ;;  %v2515_v9 = vpack.c.bf16 %v3382_v55, %v3380_v54 }
  0xae   : > { %2694 = vmatpush3.bf16.msra.mxu1 %v2691_v4  ;;  %v1418_v30 = vand.u32 4294901760, %v1417_v47  ;;  %v2703_v4 = vpack.c.bf16 %v3608_v46, %v3603_v8  ;;  %v2517_v16 = vpack.c.bf16 %v3404_v13, %v3395_v2  ;;  %v4511_v47 = vand.u32 4294901760, %v4507_v43 }
  0xaf   : > { %2506 = vmatpush1.bf16.msra.mxu0 %v2505_v48  ;;  %v2707_v48 = vpack.c.bf16 %v3649_v62, %v3640_v15  ;;  %v4512_v20 = vand.u32 4294901760, %v4508_v24  ;;  %v4513_v41 = vand.u32 4294901760, %v3549_v33  ;;  %v4514_v7 = vand.u32 4294901760, %v4509_v53 }
  0xb0   : > { %v2695_v58 = vpack.c.bf16 %v1418_v30, %v1411_v60  ;;  %2508 = vmatprep.subr.bf16.mxu0 %v2507_v18  ;;  %v2519_v18 = vpack.c.bf16 %v3411_v27, %v3408_v19  ;;  %v4515_v29 = vand.u32 4294901760, %v3341_v26  ;;  %v4517_v43 = vand.u32 4294901760, %v3357_v42 }
  0xb1   : > { %v3869_v30 = vpack.c.bf16 %v4513_v41, %v4512_v20  ;;  %v4518_v24 = vand.u32 4294901760, %v3603_v8  ;;  %v4519_v33 = vand.u32 4294901760, %v3608_v46  ;;  %v4520_v53 = vand.u32 4294901760, %v3370_v49 }
  0xb2   : > { %2696 = vmatprep.subr.bf16.mxu1 %v2695_v58  ;;  %648 = vmatmul.mubr.f32.vlgmr.msra.gmra.mrb[0].mxu0 %v3532_v37  ;;  %v3876_v37 = vpack.c.bf16 %v4515_v29, %v4514_v7  ;;  %v4521_v26 = vand.u32 4294901760, %v3372_v50  ;;  %v4523_v42 = vand.u32 4294901760, %v3382_v55  ;;  %v4524_v8 = vand.u32 4294901760, %v3640_v15 }
  0xb3   : > { %2698 = vmatpush3.bf16.msra.mxu1 %v2695_v58  ;;  %v4510_v58 = vand.u32 4294901760, %v3325_v17  ;;  %2510 = vmatpush1.bf16.msra.mxu0 %v2509_v6  ;;  %v4516_v17 = vand.u32 4294901760, %v3346_v31  ;;  %v4522_v31 = vand.u32 4294901760, %v3380_v54  ;;  %v4525_v46 = vand.u32 4294901760, %v3649_v62 }
  0xb4   : > { %2700 = vmatprep.subr.bf16.mxu1 %v2699_v0  ;;  %653 = vmatprep.mubr.f32.mxu0 %v4488_v12  ;;  %v3895_v29 = vpack.c.bf16 %v4521_v26, %v4520_v53  ;;  %v4527_v49 = vand.u32 4294901760, %v3395_v2  ;;  %v4528_v50 = vand.u32 4294901760, %v3404_v13  ;;  %v4529_v54 = vand.u32 4294901760, %v3408_v19 }
  0xb5   : > { %v3863_v60 = vpack.c.bf16 %v4511_v47, %v4510_v58  ;;  %v3882_v58 = vpack.c.bf16 %v4517_v43, %v4516_v17  ;;  %v3888_v47 = vpack.c.bf16 %v4519_v33, %v4518_v24  ;;  %2512 = vmatprep.subr.bf16.mxu0 %v2511_v11  ;;  %v3901_v7 = vpack.c.bf16 %v4523_v42, %v4522_v31  ;;  %v4526_v11 = vld [vmem:[#allocation49_spill] sm:$0xff] }
  0xb6   : > { %2301 = vmatmul.mubr.f32.vlgmr.msra.gmra.mrb[0].mxu1 %v3568_v1  ;;  %v3907_v6 = vpack.c.bf16 %v4525_v46, %v4524_v8  ;;  %v3914_v20 = vpack.c.bf16 %v4528_v50, %v4527_v49  ;;  %v4530_v55 = vand.u32 4294901760, %v3411_v27  ;;  %v4531_v15 = vand.u32 4294901760, %v3676_v61  ;;  %655 = vmatmul.mubr.f32.gmra.mrb[2].mxu0 %v3568_v1 }
  0xb7   : > { %2702 = vmatpush3.bf16.msra.mxu1 %v2699_v0  ;;  %2335 = vmatprep.mubr.f32.mxu1 %v4526_v11  ;;  %v4532_v62 = vand.u32 4294901760, %v3684_v23  ;;  %v4533_v2 = vand.u32 4294901760, %v3419_v35  ;;  %v4534_v13 = vand.u32 4294901760, %v3428_v57  ;;  %v4535_v19 = vand.u32 4294901760, %v3437_v56 }
  0xb8   : > { %v3920_v41 = vpack.c.bf16 %v4530_v55, %v4529_v54  ;;  %2704 = vmatprep.subr.bf16.mxu1 %v2703_v4  ;;  %v4536_v27 = vand.u32 4294901760, %v3439_v44  ;;  %v4537_v24 = vand.u32 4294901760, %v3710_v5  ;;  %v4538_v33 = vand.u32 4294901760, %v3718_v52  ;;  %2514 = vmatpush1.bf16.msra.mxu0 %v2513_v63 }
  0xb9   : > { %v3926_v17 = vpack.c.bf16 %v4532_v62, %v4531_v15  ;;  %v3933_v0 = vpack.c.bf16 %v4534_v13, %v4533_v2  ;;  %789 = vmatprep.mubr.f32.mxu0 %v4488_v12  ;;  %v4539_v26 = vand.u32 4294901760, %v3449_v32  ;;  %v4540_v31 = vand.u32 4294901760, %v3451_v10  ;;  %2516 = vmatprep.subr.bf16.mxu0 %v2515_v9  ;;  %v4546_v15 = vld [vmem:[#allocation36_spill] sm:$0xff]  ;;  %v4548_v13 = vld [vmem:[#allocation38_spill] sm:$0xff] }
  0xba   : > { %v3939_v43 = vpack.c.bf16 %v4536_v27, %v4535_v19  ;;  %v3945_v53 = vpack.c.bf16 %v4538_v33, %v4537_v24  ;;  %v4541_v8 = vand.u32 4294901760, %v3460_v38  ;;  %v4542_v46 = vand.u32 4294901760, %v3467_v36 }
  0xbb   : > { %v3952_v42 = vpack.c.bf16 %v4540_v31, %v4539_v26  ;;  %v4543_v50 = vand.u32 4294901760, %v3741_v3  ;;  %v4544_v54 = vand.u32 4294901760, %v3753_v59  ;;  %v4545_v63 = vand.u32 4294901760, %v3475_v40  ;;  %2706 = vmatpush3.bf16.msra.mxu1 %v2703_v4 }
  0xbc   : > { %v3958_v49 = vpack.c.bf16 %v4542_v46, %v4541_v8  ;;  %v4547_v62 = vand.u32 4294901760, %v4546_v15  ;;  %v4549_v19 = vand.u32 4294901760, %v4548_v13  ;;  %v4550_v27 = vand.u32 4294901760, %v4499_v25  ;;  %2708 = vmatprep.subr.bf16.mxu1 %v2707_v48  ;;  %2518 = vmatpush1.bf16.msra.mxu0 %v2517_v16  ;;  %v4581_v16 = vld [vmem:[#allocation31_spill] sm:$0xff] }
  0xbd   : > { %v3964_v55 = vpack.c.bf16 %v4544_v54, %v4543_v50  ;;  %v4552_v33 = vand.u32 4294901760, %v3775_v14  ;;  %v4553_v26 = vand.u32 4294901760, %v3787_v39  ;;  %v4555_v9 = vand.u32 4294901760, %v4503_v51  ;;  %2520 = vmatprep.subr.bf16.mxu0 %v2519_v18  ;;  %v4582_v18 = vld [vmem:[#allocation33_spill] sm:$0xff] }
  0xbe   : > { %v3970_v2 = vpack.c.bf16 %v4547_v62, %v4545_v63  ;;  %v3976_v24 = vpack.c.bf16 %v4550_v27, %v4549_v19  ;;  %v4556_v8 = vand.u32 4294901760, %v3511_v22  ;;  %v4557_v50 = vand.u32 4294901760, %v3515_v45  ;;  %v4559_v62 = vld [vmem:[#allocation39_spill] sm:$0xff] }
  0xbf   : > { %v3982_v31 = vpack.c.bf16 %v4553_v26, %v4552_v33  ;;  %v4558_v54 = vand.u32 4294901760, %v3518_v28  ;;  %v4560_v19 = vand.u32 4294901760, %v4559_v62  ;;  %v4561_v27 = vand.u32 4294901760, %v3820_v34  ;;  %v4562_v33 = vld [vmem:[#allocation45_spill] sm:$0xff]  ;;  %2710 = vmatpush3.bf16.msra.mxu1 %v2707_v48  ;;  %v4580_v48 = vld [vmem:[#allocation30_spill] sm:$0xff] }
  0xc0   : > { %4551 = vst [vmem:[#allocation32_spill] sm:$0xff] %v3976_v24  ;;  %v3988_v46 = vpack.c.bf16 %v4556_v8, %v4555_v9  ;;  %v4563_v26 = vand.u32 4294901760, %v4562_v33  ;;  %v2711_v4 = vpack.c.bf16 %v3684_v23, %v3676_v61  ;;  %v2521_v9 = vpack.c.bf16 %v3428_v57, %v3419_v35  ;;  %v4569_v23 = vld [vmem:[#allocation20_spill] sm:$0xff] }
  0xc1   : > { %4554 = vst [vmem:[#allocation41_spill] sm:$0xff] %v3982_v31  ;;  %v3994_v63 = vpack.c.bf16 %v4558_v54, %v4557_v50  ;;  %v4000_v1 = vpack.c.bf16 %v4561_v27, %v4560_v19  ;;  %v4564_v31 = vand.u32 4294901760, %v3544_v21  ;;  %v2523_v8 = vpack.c.bf16 %v3439_v44, %v3437_v56  ;;  %v4586_v54 = vld [vmem:[#allocation40_spill] sm:$0xff]  ;;  %v4588_v19 = vld [vmem:[#allocation43_spill] sm:$0xff] }
  0xc2   : > { %2712 = vmatprep.subr.bf16.mxu1 %v2711_v4  ;;  %v2715_v50 = vpack.c.bf16 %v3718_v52, %v3710_v5  ;;  %2522 = vmatpush1.bf16.msra.mxu0 %v2521_v9  ;;  %v2527_v61 = vpack.c.bf16 %v3467_v36, %v3460_v38  ;;  %v2719_v35 = vpack.c.bf16 %v3753_v59, %v3741_v3  ;;  %v4571_v5 = vld [vmem:[#allocation21_spill] sm:$0xff]  ;;  %v4572_v52 = vld [vmem:[#allocation22_spill] sm:$0xff]  ;;  %v4574_v3 = vld [vmem:[#allocation24_spill] sm:$0xff] }
  0xc3   : > { %v4006_v24 = vpack.c.bf16 %v4564_v31, %v4563_v26  ;;  %v2525_v31 = vpack.c.bf16 %v3451_v10, %v3449_v32  ;;  %2524 = vmatprep.subr.bf16.mxu0 %v2523_v8  ;;  %2714 = vmatpush3.bf16.msra.mxu1 %v2711_v4  ;;  %v2529_v44 = vpack.c.bf16 %v4546_v15, %v3475_v40  ;;  %v4565_v40 = vld [vmem:[#allocation15_spill] sm:$0xff]  ;;  %v4575_v59 = vld [vmem:[#allocation25_spill] sm:$0xff]  ;;  %v4589_v27 = vld [vmem:[#allocation44_spill] sm:$0xff] }
  0xc4   : > { %2716 = vmatprep.subr.bf16.mxu1 %v2715_v50  ;;  %v2531_v56 = vpack.c.bf16 %v4499_v25, %v4548_v13  ;;  %v2723_v10 = vpack.c.bf16 %v3787_v39, %v3775_v14  ;;  %v2533_v32 = vpack.c.bf16 %v3511_v22, %v4503_v51  ;;  %v2535_v38 = vpack.c.bf16 %v3518_v28, %v3515_v45  ;;  %v4566_v22 = vld [vmem:[#allocation17_spill] sm:$0xff]  ;;  %v4567_v45 = vld [vmem:[#allocation18_spill] sm:$0xff]  ;;  %v4568_v28 = vld [vmem:[#allocation52_spill] sm:$0xff] }
  0xc5   : > { %v2727_v57 = vpack.c.bf16 %v3820_v34, %v4559_v62  ;;  %v2537_v36 = vpack.c.bf16 %v3544_v21, %v4562_v33  ;;  %v4570_v21 = vld [vmem:[#allocation51_spill] sm:$0xff]  ;;  %v4576_v25 = vld [vmem:[#allocation26_spill] sm:$0xff]  ;;  %v4578_v51 = vld [vmem:[#allocation28_spill] sm:$0xff] }
  0xc6   : > { %2526 = vmatpush1.bf16.msra.mxu0 %v2525_v31  ;;  %v4573_v14 = vld [vmem:[#allocation23_spill] sm:$0xff]  ;;  %v4579_v34 = vld [vmem:[#allocation29_spill] sm:$0xff]  ;;  %v4587_v62 = vld [vmem:[#allocation42_spill] sm:$0xff] }
  0xc7   : > { %2528 = vmatprep.subr.bf16.mxu0 %v2527_v61  ;;  %2718 = vmatpush3.bf16.msra.mxu1 %v2715_v50  ;;  %v4577_v39 = vld [vmem:[#allocation27_spill] sm:$0xff]  ;;  %v4585_v13 = vld [vmem:[#allocation37_spill] sm:$0xff]  ;;  %v4590_v33 = vld [vmem:[#allocation48_spill] sm:$0xff] }
  0xc8   : > { %2720 = vmatprep.subr.bf16.mxu1 %v2719_v35  ;;  %v4584_v15 = vld [vmem:[#allocation35_spill] sm:$0xff]  ;;  %v4591_v26 = vld [vmem:[#allocation53_spill] sm:$0xff]  ;;  %v4592_v4 = vld [vmem:[#allocation46_spill] sm:$0xff] }
  0xca   : > { %2530 = vmatpush1.bf16.msra.mxu0 %v2529_v44 }
  0xcb   : > { %2532 = vmatprep.subr.bf16.mxu0 %v2531_v56  ;;  %2722 = vmatpush3.bf16.msra.mxu1 %v2719_v35 }
  0xcc   : > { %2724 = vmatprep.subr.bf16.mxu1 %v2723_v10 }
  0xce   : > { %2534 = vmatpush1.bf16.msra.mxu0 %v2533_v32 }
  0xcf   : > { %2536 = vmatprep.subr.bf16.mxu0 %v2535_v38  ;;  %2726 = vmatpush3.bf16.msra.mxu1 %v2723_v10 }
  0xd0   : > { %2728 = vmatprep.subr.bf16.mxu1 %v2727_v57 }
  0xd2   : > { %2538 = vmatpush1.bf16.msra.mxu0 %v2537_v36 }
  0xd3   : > { %2540 = vmatprep.subr.bf16.mxu0 %v4565_v40  ;;  %2730 = vmatpush3.bf16.msra.mxu1 %v2727_v57 }
  0xd4   : > { %2732 = vmatprep.subr.bf16.mxu1 %v4566_v22 }
  0xd5   : > { %792 = vmatmul.mubr.f32.vlgmr.msra.gmra.mrb[0].mxu0 %v4526_v11  ;;  %v4583_v11 = vld [vmem:[#allocation34_spill] sm:$0xff] }
  0xd6   : > { %2542 = vmatpush1.bf16.msra.mxu0 %v4567_v45  ;;  %797 = vmatprep.mubr.f32.mxu0 %v4488_v12 }
  0xd7   : > { %2336 = vmatmul.mubr.f32.vlgmr.msra.gmra.mrb[0].mxu1 %v4568_v28  ;;  %2544 = vmatprep.subr.bf16.mxu0 %v4569_v23 }
  0xd8   : > { %2734 = vmatpush3.bf16.msra.mxu1 %v4566_v22  ;;  %2370 = vmatprep.mubr.f32.mxu1 %v4570_v21 }
  0xd9   : > { %2736 = vmatprep.subr.bf16.mxu1 %v4571_v5  ;;  %800 = vmatmul.mubr.f32.gmra.mrb[2].mxu0 %v4568_v28 }
  0xda   : > { %2546 = vmatpush1.bf16.msra.mxu0 %v4572_v52  ;;  %902 = vmatprep.mubr.f32.mxu0 %v4488_v12 }
  0xdb   : > { %2548 = vmatprep.subr.bf16.mxu0 %v4573_v14 }
  0xdc   : > { %2738 = vmatpush3.bf16.msra.mxu1 %v4571_v5 }
  0xdd   : > { %2740 = vmatprep.subr.bf16.mxu1 %v4574_v3 }
  0xde   : > { %2550 = vmatpush1.bf16.msra.mxu0 %v4575_v59 }
  0xdf   : > { %2552 = vmatprep.subr.bf16.mxu0 %v4576_v25 }
  0xe0   : > { %2742 = vmatpush3.bf16.msra.mxu1 %v4574_v3 }
  0xe1   : > { %2744 = vmatprep.subr.bf16.mxu1 %v4577_v39 }
  0xe2   : > { %2554 = vmatpush1.bf16.msra.mxu0 %v4578_v51 }
  0xe3   : > { %2556 = vmatprep.subr.bf16.mxu0 %v4579_v34 }
  0xe4   : > { %2746 = vmatpush3.bf16.msra.mxu1 %v4577_v39 }
  0xe5   : > { %2748 = vmatprep.subr.bf16.mxu1 %v4580_v48 }
  0xe6   : > { %2558 = vmatpush1.bf16.msra.mxu0 %v4581_v16 }
  0xe7   : > { %2560 = vmatprep.subr.bf16.mxu0 %v4582_v18 }
  0xe8   : > { %2750 = vmatpush3.bf16.msra.mxu1 %v4580_v48 }
  0xe9   : > { %2752 = vmatprep.subr.bf16.mxu1 %v4583_v11 }
  0xea   : > { %2562 = vmatpush1.bf16.msra.mxu0 %v4584_v15 }
  0xeb   : > { %2564 = vmatprep.subr.bf16.mxu0 %v4585_v13 }
  0xec   : > { %2754 = vmatpush3.bf16.msra.mxu1 %v4583_v11 }
  0xed   : > { %2756 = vmatprep.subr.bf16.mxu1 %v4586_v54 }
  0xee   : > { %2566 = vmatpush1.bf16.msra.mxu0 %v4587_v62 }
  0xef   : > { %2568 = vmatprep.subr.bf16.mxu0 %v4588_v19 }
  0xf0   : > { %2758 = vmatpush3.bf16.msra.mxu1 %v4586_v54 }
  0xf1   : > { %2760 = vmatprep.subr.bf16.mxu1 %v4589_v27 }
  0xf2   : > { %2570 = vmatpush1.bf16.msra.mxu0 %v4590_v33 }
  0xf3   : > { %2572 = vmatprep.subr.bf16.mxu0 %v3863_v60  ;;  %v4594_v60 = vld [vmem:[#allocation41_spill] sm:$0xff] }
  0xf4   : > { %2762 = vmatpush3.bf16.msra.mxu1 %v4589_v27 }
  0xf5   : > { %2764 = vmatprep.subr.bf16.mxu1 %v3869_v30  ;;  %906 = vmatmul.mubr.f32.vlgmr.msra.gmra.mrb[0].mxu0 %v4570_v21 }
  0xf6   : > { %2574 = vmatpush1.bf16.msra.mxu0 %v3876_v37  ;;  %911 = vmatprep.mubr.f32.mxu0 %v4488_v12  ;;  %v4593_v37 = vld [vmem:[#allocation32_spill] sm:$0xff] }
  0xf7   : > { %2371 = vmatmul.mubr.f32.vlgmr.msra.gmra.mrb[0].mxu1 %v4591_v26  ;;  %2576 = vmatprep.subr.bf16.mxu0 %v3882_v58 }
  0xf8   : > { %2766 = vmatpush3.bf16.msra.mxu1 %v3869_v30  ;;  %2405 = vmatprep.mubr.f32.mxu1 %v4592_v4  ;;  %v4595_v30 = vld [vmem:[#allocation50_spill] sm:$0xff] }
  0xf9   : > { %2768 = vmatprep.subr.bf16.mxu1 %v3888_v47  ;;  %915 = vmatmul.mubr.f32.gmra.mrb[2].mxu0 %v4591_v26 }
  0xfa   : > { %2578 = vmatpush1.bf16.msra.mxu0 %v3895_v29  ;;  %1081 = vmatprep.mubr.f32.mxu0 %v4488_v12 }
  0xfb   : > { %2580 = vmatprep.subr.bf16.mxu0 %v3901_v7 }
  0xfc   : > { %2770 = vmatpush3.bf16.msra.mxu1 %v3888_v47 }
  0xfd   : > { %2772 = vmatprep.subr.bf16.mxu1 %v3907_v6 }
  0xfe   : > { %2582 = vmatpush1.bf16.msra.mxu0 %v3914_v20 }
  0xff   : > { %2584 = vmatprep.subr.bf16.mxu0 %v3920_v41 }
 0x100   : > { %2774 = vmatpush3.bf16.msra.mxu1 %v3907_v6 }
 0x101   : > { %2776 = vmatprep.subr.bf16.mxu1 %v3926_v17 }
 0x102   : > { %2586 = vmatpush1.bf16.msra.mxu0 %v3933_v0 }
 0x103   : > { %2588 = vmatprep.subr.bf16.mxu0 %v3939_v43 }
 0x104   : > { %2778 = vmatpush3.bf16.msra.mxu1 %v3926_v17 }
 0x105   : > { %2780 = vmatprep.subr.bf16.mxu1 %v3945_v53 }
 0x106   : > { %2590 = vmatpush1.bf16.msra.mxu0 %v3952_v42 }
 0x107   : > { %2592 = vmatprep.subr.bf16.mxu0 %v3958_v49 }
 0x108   : > { %2782 = vmatpush3.bf16.msra.mxu1 %v3945_v53 }
 0x109   : > { %2784 = vmatprep.subr.bf16.mxu1 %v3964_v55 }
 0x10a   : > { %2594 = vmatpush1.bf16.msra.mxu0 %v3970_v2 }
 0x10b   : > { %2596 = vmatprep.subr.bf16.mxu0 %v4593_v37 }
 0x10c   : > { %2786 = vmatpush3.bf16.msra.mxu1 %v3964_v55 }
 0x10d   : > { %2788 = vmatprep.subr.bf16.mxu1 %v4594_v60 }
 0x10e   : > { %2598 = vmatpush1.bf16.msra.mxu0 %v3988_v46 }
 0x10f   : > { %2600 = vmatprep.subr.bf16.mxu0 %v3994_v63 }
 0x110   : > { %2790 = vmatpush3.bf16.msra.mxu1 %v4594_v60 }
 0x111   : > { %2792 = vmatprep.subr.bf16.mxu1 %v4000_v1 }
 0x112   : > { %2602 = vmatpush1.bf16.msra.mxu0 %v4006_v24 }
 0x113   : > { %2604 = vmatprep.subr.bf16.mxu0 %v4565_v40 }
 0x114   : > { %2794 = vmatpush3.bf16.msra.mxu1 %v4000_v1 }
 0x115   : > { %2796 = vmatprep.subr.bf16.mxu1 %v4566_v22  ;;  %1083 = vmatmul.mubr.f32.vlgmr.msra.gmra.mrb[0].mxu0 %v4592_v4 }
 0x116   : > { %2606 = vmatpush1.bf16.msra.mxu0 %v4567_v45  ;;  %1088 = vmatprep.mubr.f32.mxu0 %v4488_v12 }
 0x117   : > { %2406 = vmatmul.mubr.f32.vlgmr.msra.gmra.mrb[0].mxu1 %v4595_v30  ;;  %2608 = vmatprep.subr.bf16.mxu0 %v4569_v23 }
 0x118   : > { %2798 = vmatpush3.bf16.msra.mxu1 %v4566_v22  ;;  %2440 = vmatprep.mubr.f32.mxu1 %v4592_v4 }
 0x119   : > { %2800 = vmatprep.subr.bf16.mxu1 %v4571_v5  ;;  %1090 = vmatmul.mubr.f32.gmra.mrb[2].mxu0 %v4595_v30 }
 0x11a   : > { %2610 = vmatpush1.bf16.msra.mxu0 %v4572_v52  ;;  %1192 = vmatprep.mubr.f32.mxu0 %v4488_v12 }
 0x11b   : > { %2612 = vmatprep.subr.bf16.mxu0 %v4573_v14 }
 0x11c   : > { %2802 = vmatpush3.bf16.msra.mxu1 %v4571_v5 }
 0x11d   : > { %2804 = vmatprep.subr.bf16.mxu1 %v4574_v3 }
 0x11e   : > { %2614 = vmatpush1.bf16.msra.mxu0 %v4575_v59 }
 0x11f   : > { %2616 = vmatprep.subr.bf16.mxu0 %v4576_v25 }
 0x120   : > { %2806 = vmatpush3.bf16.msra.mxu1 %v4574_v3 }
 0x121   : > { %2808 = vmatprep.subr.bf16.mxu1 %v4577_v39 }
 0x122   : > { %2618 = vmatpush1.bf16.msra.mxu0 %v4578_v51 }
 0x123   : > { %2620 = vmatprep.subr.bf16.mxu0 %v4579_v34 }
 0x124   : > { %2810 = vmatpush3.bf16.msra.mxu1 %v4577_v39 }
 0x125   : > { %2812 = vmatprep.subr.bf16.mxu1 %v4580_v48 }
 0x126   : > { %2622 = vmatpush1.bf16.msra.mxu0 %v4581_v16 }
 0x127   : > { %2624 = vmatprep.subr.bf16.mxu0 %v4582_v18 }
 0x128   : > { %2814 = vmatpush3.bf16.msra.mxu1 %v4580_v48 }
 0x129   : > { %2816 = vmatprep.subr.bf16.mxu1 %v4583_v11 }
 0x12a   : > { %2626 = vmatpush1.bf16.msra.mxu0 %v4584_v15 }
 0x12b   : > { %2628 = vmatprep.subr.bf16.mxu0 %v4585_v13 }
 0x12c   : > { %2818 = vmatpush3.bf16.msra.mxu1 %v4583_v11 }
 0x12d   : > { %2820 = vmatprep.subr.bf16.mxu1 %v4586_v54 }
 0x12e   : > { %2630 = vmatpush1.bf16.msra.mxu0 %v4587_v62 }
 0x12f   : > { %2632 = vmatprep.subr.bf16.mxu0 %v4588_v19 }
 0x130   : > { %2822 = vmatpush3.bf16.msra.mxu1 %v4586_v54 }
 0x131   : > { %2824 = vmatprep.subr.bf16.mxu1 %v4589_v27 }
 0x132   : > { %2634 = vmatpush1.bf16.msra.mxu0 %v4590_v33 }
 0x134   : > { %2826 = vmatpush3.bf16.msra.mxu1 %v4589_v27 }
 0x135   : > { %1194 = vmatmul.mubr.f32.vlgmr.msra.gmra.mrb[0].mxu0 %v4592_v4 }
 0x136   : > { %1199 = vmatprep.mubr.f32.mxu0 %v4488_v12 }
 0x137   : > { %2441 = vmatmul.mubr.f32.vlgmr.msra.gmra.mrb[0].mxu1 %v4595_v30 }
 0x139   : > { %1201 = vmatmul.mubr.f32.gmra.mrb[2].mxu0 %v4595_v30 }
 0x208   : > { %v1195_v1 = vpop.f32.mrb[0].mxu0 }
 0x209   : > { %1891 = vst [vmem:[%s234_s21] sm:$0xff] %v1195_v1  ;;  %v1197_v58 = vpop.f32.mrb[1].mxu0 }
 0x20a   : > { %v2442_v12 = vpop.f32.mrb[0].mxu1  ;;  %1893 = vst [vmem:[%s241_s10] sm:$0xff] %v1197_v58 }
 0x20b   : > { %1896 = vst [vmem:[%s248_s29 + $0x8] sm:$0xff] %v2442_v12  ;;  %v1881_v47 = vpop.f32.mrb[1].mxu1 }
 0x20c   : > { %1895 = vst [vmem:[%s248_s29] sm:$0xff] %v1881_v47  ;;  %v1202_v29 = vpop.f32.mrb[2].mxu0  ;;  %s3128_s29 = smov [#allocation7]  }
 0x20d   : > { %1892 = vst [vmem:[%s234_s21 + $0x8] sm:$0xff] %v1202_v29  ;;  %v1204_v7 = vpop.f32.mrb[3].mxu0  ;;  %s2993_s13 = sshll.u32 %s3128_s29, 4  ;;  %s2994_s13 = int_to_ptr.vmem [resolvable:$false] %s2993_s13 }
 0x20e   : > { %1894 = vst [vmem:[%s241_s10 + $0x8] sm:$0xff] %v1204_v7  ;;  %s2995_s24 = scalar_lea.vmem %s2994_s13, 512  ;;  %p2996_p10 = scmp.lt.s32.totalorder %s4156_s23, %s2994_s13 }
 0x20f   : > { %p2997_p13 = scmp.lt.s32.totalorder %s2995_s24, %s2989_s25 }
 0x211   : > { %p2998_p3 = por %p2997_p13, %p2996_p10 }
 0x213   : > { %p2999_p7 = pnand %p2998_p3, %p2992_p8 }
 0x215   : > { %3002 = shalt.err (!%p2999_p7)
}
 0x216   : > { %s3003_s20 = scalar_lea.hbm %s4166_s12, 256  ;;  %s3007_s6 = scalar_lea.hbm %s4283_s2, 512 }
 0x217   : > { %p3004_p9 = scmp.ne.s32.totalorder %s4166_s12, %s3003_s20  ;;  %p3008_p5 = scmp.lt.u32.totalorder %s4166_s12, %s4283_s2 }
 0x218   : > { %p3009_p11 = scmp.lt.u32.totalorder %s3007_s6, %s3003_s20  ;;  %p3011_p4 = scmp.lt.u32.totalorder %s3003_s20, %s4166_s12 }
 0x219   : > { %p3005_p2 = pnand %p3004_p9, %p3251_p12 }
 0x21a   : > { %p3010_p1 = por %p3009_p11, %p3008_p5 }
 0x21b   : > { %p3006_p0 = pneg %p3005_p2 }
 0x21c   : > { %p3012_p6 = por %p3011_p4, %p3010_p1 }
 0x21e   : > { %p3013_p8 = pnand %p3012_p6, %p3006_p0 }
 0x220   : > { %3016 = shalt.err (!%p3013_p8)
}
 0x221   : > { %s3129_s25 = smov 128   ;;  %s3130_s13 = smov 8  }
 0x222   : > { %2863 = dma.vmem_to_hbm [thread:$0]  (%p3251_p12), %s4156_s23, 256, %s4166_s12, %s1898_s9, %s3129_s25, %s3129_s25, %s3130_s13  }
 0x223   : > { %s4596_s24 = sand.u32 1, %s3179_s19   ;;  %s3017_s21 = scalar_lea.vmem %s4160_s28, 256 }
 0x224   : > { %s4209_s20 = scalar_lea.sflag [#allocation9], %s4596_s24  ;;  %p3018_p10 = scmp.ne.s32.totalorder %s4160_s28, %s3017_s21 }
 0x225   : > { %s3131_s10 = smov [#allocation8]  }
 0x226   : > { %p3019_p13 = pnand %p3018_p10, %p3251_p12  ;;  %s3021_s6 = sshll.u32 %s3131_s10, 4  ;;  %s3022_s6 = int_to_ptr.vmem [resolvable:$false] %s3021_s6 }
 0x227   : > { %s3023_s8 = scalar_lea.vmem %s3022_s6, 512  ;;  %p3024_p7 = scmp.lt.s32.totalorder %s4160_s28, %s3022_s6 }
 0x228   : > { %p3020_p3 = pneg %p3019_p13  ;;  %p3025_p9 = scmp.lt.s32.totalorder %s3023_s8, %s3017_s21 }
 0x22a   : > { %p3026_p2 = por %p3025_p9, %p3024_p7 }
 0x22c   : > { %p3027_p0 = pnand %p3026_p2, %p3020_p3 }
 0x22e   : > { %3030 = shalt.err (!%p3027_p0)
}
 0x22f   : > { %s3031_s19 = scalar_lea.hbm %s4171_s7, 256  ;;  %s3035_s12 = scalar_lea.hbm %s4284_s3, 512 }
 0x230   : > { %p3032_p5 = scmp.ne.s32.totalorder %s4171_s7, %s3031_s19  ;;  %p3036_p4 = scmp.lt.u32.totalorder %s4171_s7, %s4284_s3 }
 0x231   : > { %p3037_p6 = scmp.lt.u32.totalorder %s3035_s12, %s3031_s19  ;;  %p3039_p10 = scmp.lt.u32.totalorder %s3031_s19, %s4171_s7 }
 0x232   : > { %p3033_p11 = pnand %p3032_p5, %p3251_p12 }
 0x233   : > { %p3038_p8 = por %p3037_p6, %p3036_p4 }
 0x234   : > { %p3034_p1 = pneg %p3033_p11 }
 0x235   : > { %p3040_p13 = por %p3039_p10, %p3038_p8 }
 0x237   : > { %p3041_p3 = pnand %p3040_p13, %p3034_p1 }
 0x239   : > { %3044 = shalt.err (!%p3041_p3)
}
 0x23a   : > { %2864 = dma.vmem_to_hbm [thread:$0]  (%p3251_p12), %s4160_s28, 256, %s4171_s7, %s4209_s20, %s3129_s25, %s3129_s25, %s3130_s13  }
 0x23b   : > { %s3045_s24 = scalar_lea.vmem %s4173_s11, 256  ;;  %s3132_s21 = smov [#allocation10]  }
 0x23c   : > { %p3046_p7 = scmp.ne.s32.totalorder %s4173_s11, %s3045_s24  ;;  %s3049_s10 = sshll.u32 %s3132_s21, 4  ;;  %s3050_s10 = int_to_ptr.vmem [resolvable:$false] %s3049_s10 }
 0x23d   : > { %s3051_s6 = scalar_lea.vmem %s3050_s10, 512  ;;  %p3052_p0 = scmp.lt.s32.totalorder %s4173_s11, %s3050_s10 }
 0x23e   : > { %p3047_p9 = pnand %p3046_p7, %p3251_p12  ;;  %p3053_p5 = scmp.lt.s32.totalorder %s3051_s6, %s3045_s24 }
 0x240   : > { %p3048_p2 = pneg %p3047_p9  ;;  %p3054_p11 = por %p3053_p5, %p3052_p0 }
 0x242   : > { %p3055_p1 = pnand %p3054_p11, %p3048_p2 }
 0x244   : > { %3058 = shalt.err (!%p3055_p1)
}
 0x245   : > { %s3059_s28 = scalar_lea.hbm %s4178_s26, 256  ;;  %s3063_s19 = scalar_lea.hbm %s4285_s4, 512 }
 0x246   : > { %p3060_p4 = scmp.ne.s32.totalorder %s4178_s26, %s3059_s28  ;;  %p3064_p10 = scmp.lt.u32.totalorder %s4178_s26, %s4285_s4 }
 0x247   : > { %p3065_p13 = scmp.lt.u32.totalorder %s3063_s19, %s3059_s28  ;;  %p3067_p7 = scmp.lt.u32.totalorder %s3059_s28, %s4178_s26 }
 0x248   : > { %p3061_p6 = pnand %p3060_p4, %p3251_p12 }
 0x249   : > { %p3066_p3 = por %p3065_p13, %p3064_p10 }
 0x24a   : > { %p3062_p8 = pneg %p3061_p6 }
 0x24b   : > { %p3068_p9 = por %p3067_p7, %p3066_p3 }
 0x24d   : > { %p3069_p2 = pnand %p3068_p9, %p3062_p8 }
 0x24f   : > { %3072 = shalt.err (!%p3069_p2)
}
 0x250   : > { %2865 = dma.vmem_to_hbm [thread:$0]  (%p3251_p12), %s4173_s11, 256, %s4178_s26, %s4209_s20, %s3129_s25, %s3129_s25, %s3130_s13  }
 0x251 PF: > { %s1968_s12 = sand.u32 1, %s3107_s15   ;;  %p4597_p0 = scmp.ne.s32.totalorder %s4427_s22, 0 }
 0x252   : > { %p4598_p5 = scmp.ge.s32.totalorder %s3119_s18, 2  ;;  %s1969_s9 = scalar_lea.sflag [#allocation4], %s1968_s12 }
 0x254   : > { %p2878_p11 = pnand %p4598_p5, %p4597_p0 }
 0x256   : > { %3098 = dma.done.wait (!%p2878_p11), %s1969_s9, 256  }
 0x257   : > { %3100 = vsyncadd (!%p2878_p11), %s1969_s9, 4294967040  ;;  %s4599_s5 = sadd.s32 4294967294, %s3119_s18  }
 0x258   : > { %s1977_s29 = sand.u32 1, %s4599_s5  }
 0x259   : > { %s1978_s24 = scalar_lea.sflag [#allocation9], %s1977_s29 }
 0x25a   : > { %3102 = dma.done.wait (!%p2878_p11), %s1978_s24, 512  }
 0x25b   : > { %3104 = vsyncadd (!%p2878_p11), %s1978_s24, 4294966784  ;;  %p22_p12 = scmp.ge.s32.totalorder %s3216_s27, 4   ;;  %s4600_s15 = smov %s3111_s16 }
 0x25c   : > { %s4601_s16 = smov %s3115_s17  ;;  %s4602_s17 = smov %s3247_s30 }
 0x25d   : > { %s4603_s18 = smov %s3216_s27  ;;  %24 = sbr.rel (!%p22_p12) target bundleno = 8 (0x8), region = 109 }
 0x264   :  { %1992 = vsyncpa [#allocation3], 1 }
 0x265   :  { %1994 = vsyncpa [#allocation3 + $0x1], 1 }
 0x266   :  { %1995 = vsyncpa [#allocation6], 1 }
 0x267   :  { %1996 = vsyncpa [#allocation4], 1 }
 0x268   :  { %1998 = vsyncpa [#allocation4 + $0x1], 1 }
 0x269   :  { %1999 = vsyncpa [#allocation9], 1 }
 0x26a   :  { %2001 = vsyncpa [#allocation9 + $0x1], 1 }

</bundles_post_ra>
